<compile_context>
chip_gen: v6e
topology: v6e:2x2x1
jax: 0.10.0
libtpu: 0.0.40
codegen_flags: <defaults>
</compile_context>

<pallas_src>
import jax
import jax.numpy as jnp
import numpy as np
from jax import lax
from jax.experimental import pallas as pl
from jax.experimental.pallas import tpu as pltpu


BT_SUB = 128     # boards per inner compute tile == one full lane dimension
BT_BLOCK = 512   # boards per grid step (multiple of BT_SUB; 512-2048 per review)


def net3_kernel(scal_ref, x_ref, wconv_ref, wfc_ref, out_ref):
    """Fused conv3x3(5->1, pad=1) + ReLU + Linear(64->1) + sigmoid, batch on lanes.

    scal_ref : SMEM (2,)             f32  [conv bias, fc bias]
    x_ref    : VMEM (320, BT_BLOCK)  f32  flat boards, sublane idx = c*64+h*8+w
    wconv_ref: VMEM (64, 320)        f32  Toeplitz conv matrix (resident)
    wfc_ref  : VMEM (64, BT_SUB)     f32  fc weight broadcast across lanes (resident)
    out_ref  : VMEM (1, BT_BLOCK)    f32  sigmoid(logit) per board
    """
    bconv = scal_ref[0]
    bfc = scal_ref[1]
    n_sub = x_ref.shape[-1] // BT_SUB

    def sub_tile(t, carry):
        off = pl.multiple_of(t * BT_SUB, BT_SUB)
        x = x_ref[:, pl.ds(off, BT_SUB)]                          # (320, 128)
        # Whole conv (45 taps, zero-padding baked into the matrix) as one
        # f32 MXU matmul: (64, 320) @ (320, 128).
        conv = jnp.dot(wconv_ref[...], x,
                       preferred_element_type=jnp.float32) + bconv
        relu = jnp.maximum(conv, 0.0)                             # (64, 128)
        # Linear(64, 1) per board: view(-1) order is h*8+w == conv row order.
        logit = (relu * wfc_ref[...]).sum(axis=0, keepdims=True) + bfc   # (1, 128)
        out_ref[:, pl.ds(off, BT_SUB)] = 1.0 / (1.0 + jnp.exp(-logit))
        return carry

    lax.fori_loop(0, n_sub, sub_tile, 0, unroll=True)


def _conv_toeplitz(wconv):
    """(1,5,3,3) conv weights -> (64, 320) matrix with out_flat = W @ x_flat.

    Row index = oh*8 + ow (conv output order == view(-1) order).
    Col index = c*64 + ih*8 + iw (flat NCHW board).
    Host-side, runs once at model-load time (off the hot path).
    """
    w = np.asarray(jax.device_get(wconv), dtype=np.float32).reshape(5, 3, 3)
    W = np.zeros((64, 320), dtype=np.float32)
    for oh in range(8):
        for ow in range(8):
            o = oh * 8 + ow
            for c in range(5):
                for kh in range(3):
                    ih = oh + kh - 1
                    if not 0 <= ih < 8:
                        continue
                    for kw in range(3):
                        iw = ow + kw - 1
                        if not 0 <= iw < 8:
                            continue
                        W[o, c * 64 + ih * 8 + iw] = w[c, kh, kw]
    return jnp.asarray(W)


def prepare_params(wconv, bconv, wfc, bfc):
    """Pack PyTorch-layout parameters once (model-load time, off the hot path).

    wconv: (1, 5, 3, 3)  bconv: (1,)  wfc: (1, 64)  bfc: (1,)
    Returns (scal, wconv_mat, wfc_bcast).
    """
    scal = jnp.concatenate([bconv.reshape(1), bfc.reshape(1)]).astype(jnp.float32)
    wconv_mat = _conv_toeplitz(wconv)                               # (64, 320)
    wfc_bcast = jnp.broadcast_to(
        wfc.reshape(64, 1).astype(jnp.float32), (64, BT_SUB))       # (64, 128)
    return scal, wconv_mat, wfc_bcast


def nchw_to_lane_major(x_nchw):
    """(B, 5, 8, 8) NCHW boards -> (320, B) lane-major kernel layout.

    One fused reshape+transpose.  Prefer having the board generator emit the
    (320, B) layout directly: this conversion costs roughly as much HBM
    traffic as the kernel itself (perf-review item).
    """
    B = x_nchw.shape[0]
    return jnp.transpose(x_nchw.reshape(B, 5 * 8 * 8), (1, 0)).astype(jnp.float32)


def net3_forward(x_lane, scal, wconv_mat, wfc_bcast, *, block=BT_BLOCK):
    """Batched Net3 forward.

    x_lane: (320, B) f32 lane-major flat boards (sublane idx = c*64 + h*8 + w).
    Returns (B,) probabilities.
    """
    assert block % BT_SUB == 0
    feat, B = x_lane.shape
    assert feat == 320
    nb = pl.cdiv(B, block)
    Bp = nb * block
    if Bp != B:
        # Lane-only zero pad; padded lanes produce sigmoid(bias)-ish garbage
        # that is removed by the final [:B] slice.
        x_lane = jnp.pad(x_lane, ((0, 0), (0, Bp - B)))

    out = pl.pallas_call(
        net3_kernel,
        out_shape=jax.ShapeDtypeStruct((1, Bp), jnp.float32),
        grid=(nb,),
        in_specs=[
            pl.BlockSpec(memory_space=pltpu.SMEM),               # packed biases
            pl.BlockSpec((320, block), lambda i: (0, i)),        # board lane block
            pl.BlockSpec((64, 320), lambda i: (0, 0)),           # resident conv matrix
            pl.BlockSpec((64, BT_SUB), lambda i: (0, 0)),        # resident fc weight
        ],
        out_specs=pl.BlockSpec((1, block), lambda i: (0, i)),    # lane-dense output
        compiler_params=pltpu.CompilerParams(
            dimension_semantics=("parallel",),        # 2 TensorCores on v7x (grid >= 2)
            vmem_limit_bytes=32 * 1024 * 1024,        # headroom for larger blocks on v5e
        ),
    )(scal, x_lane, wconv_mat, wfc_bcast)

    return out.reshape(Bp)[:B]


def net3_reference(x_nchw, wconv, bconv, wfc, bfc):
    """Pure-JAX reference matching the PyTorch module, applied per board."""
    out = lax.conv_general_dilated(
        x_nchw, wconv, window_strides=(1, 1), padding=((1, 1), (1, 1)),
        dimension_numbers=("NCHW", "OIHW", "NCHW"),
        precision=lax.Precision.HIGHEST)                           # (B, 1, 8, 8)
    out = jnp.maximum(out + bconv.reshape(1, 1, 1, 1), 0.0)
    flat = out.reshape(out.shape[0], 64)                           # view(-1) per board
    logit = (flat * wfc.reshape(1, 64)).sum(axis=-1) + bfc[0]
    return jax.nn.sigmoid(logit)                                   # (B,)


if __name__ == "__main__":
    key = jax.random.PRNGKey(0)
    kx, kw1, kb1, kw2, kb2 = jax.random.split(key, 5)

    # Deterministic parameter init (PyTorch-style uniform(-1/sqrt(fan_in), ...)).
    fan_conv = 5 * 3 * 3
    fan_fc = 64
    wconv = jax.random.uniform(kw1, (1, 5, 3, 3), jnp.float32,
                               -1.0 / jnp.sqrt(fan_conv), 1.0 / jnp.sqrt(fan_conv))
    bconv = jax.random.uniform(kb1, (1,), jnp.float32,
                               -1.0 / jnp.sqrt(fan_conv), 1.0 / jnp.sqrt(fan_conv))
    wfc = jax.random.uniform(kw2, (1, 64), jnp.float32,
                             -1.0 / jnp.sqrt(fan_fc), 1.0 / jnp.sqrt(fan_fc))
    bfc = jax.random.uniform(kb2, (1,), jnp.float32,
                             -1.0 / jnp.sqrt(fan_fc), 1.0 / jnp.sqrt(fan_fc))

    # Boards in the module's NCHW convention (game-tree-search-style batch).
    # B = 1152 exercises a 3-step grid (megacore-splittable on v7x), the
    # 4-iteration inner lane loop, and the lane-padding path (1152 -> 1536).
    B = 1152
    x_nchw = jax.random.normal(kx, (B, 5, 8, 8), jnp.float32)

    scal, wconv_mat, wfc_bcast = prepare_params(wconv, bconv, wfc, bfc)  # once, off hot path

    # Producer-side layout step (done once, outside the kernel hot path); a
    # real board generator should emit the (320, B) layout directly.
    x_lane = nchw_to_lane_major(x_nchw)

    fwd = jax.jit(net3_forward)
    y = jax.block_until_ready(fwd(x_lane, scal, wconv_mat, wfc_bcast))
    y_ref = jax.block_until_ready(net3_reference(x_nchw, wconv, bconv, wfc, bfc))

    assert y.shape == (B,)
    assert jnp.allclose(y, y_ref, atol=1e-5, rtol=1e-5), (y[:4], y_ref[:4])
    print("KERNEL_OK")
</pallas_src>

<mosaic_0001>
module attributes {stable_mosaic.version = 11 : i64} {
  func.func @net3_kernel(%arg0: i32, %arg1: memref<2xf32, #tpu.memory_space<smem>>, %arg2: memref<320x512xf32, #tpu.memory_space<vmem>>, %arg3: memref<64x320xf32, #tpu.memory_space<vmem>>, %arg4: memref<64x128xf32, #tpu.memory_space<vmem>>, %arg5: memref<1x512xf32, #tpu.memory_space<vmem>>) attributes {dimension_semantics = [#tpu.dimension_semantics<parallel>], iteration_bounds = array<i64: 3>, scalar_prefetch = 0 : i64, scratch_operands = 0 : i64, tpu.core_type = #tpu.core_type<tc>, window_params = [{transform_indices = @transform_0, window_bounds = array<i64: 2>}, {transform_indices = @transform_1, window_bounds = array<i64: 320, 512>}, {pipeline_mode = #tpu.pipeline_mode<synchronous>, transform_indices = @transform_2, window_bounds = array<i64: 64, 320>}, {pipeline_mode = #tpu.pipeline_mode<synchronous>, transform_indices = @transform_3, window_bounds = array<i64: 64, 128>}, {transform_indices = @transform_4, window_bounds = array<i64: 1, 512>}]} {
    %c0 = arith.constant 0 : index
    %0 = memref.load %arg1[%c0] : memref<2xf32, #tpu.memory_space<smem>>
    %c1 = arith.constant 1 : index
    %1 = memref.load %arg1[%c1] : memref<2xf32, #tpu.memory_space<smem>>
    %c0_i32 = arith.constant 0 : i32
    %c128_i32 = arith.constant 128 : i32
    %2 = arith.muli %c0_i32, %c128_i32 : i32
    %3 = tpu.assume_multiple %2, 128 : i32
    %c0_0 = arith.constant 0 : index
    %4 = arith.index_cast %3 : i32 to index
    %5 = vector.load %arg2[%c0_0, %4] : memref<320x512xf32, #tpu.memory_space<vmem>>, vector<320x128xf32>
    %c0_1 = arith.constant 0 : index
    %c0_2 = arith.constant 0 : index
    %6 = vector.load %arg3[%c0_1, %c0_2] : memref<64x320xf32, #tpu.memory_space<vmem>>, vector<64x320xf32>
    %cst = arith.constant dense<0.000000e+00> : vector<64x128xf32>
    %7 = tpu.matmul %6, %5, %cst {dimension_numbers = #tpu.dot_dimension_numbers<[1], [0], [0], [1], [0, 0, 1, 1], [], []>} : vector<64x320xf32>, vector<320x128xf32>, vector<64x128xf32> -> vector<64x128xf32>
    %8 = vector.broadcast %0 : f32 to vector<64x128xf32>
    %9 = arith.addf %7, %8 : vector<64x128xf32>
    %cst_3 = arith.constant 0.000000e+00 : f32
    %10 = vector.broadcast %cst_3 : f32 to vector<64x128xf32>
    %11 = arith.maximumf %9, %10 : vector<64x128xf32>
    %c0_4 = arith.constant 0 : index
    %c0_5 = arith.constant 0 : index
    %12 = vector.load %arg4[%c0_4, %c0_5] : memref<64x128xf32, #tpu.memory_space<vmem>>, vector<64x128xf32>
    %13 = arith.mulf %11, %12 : vector<64x128xf32>
    %cst_6 = arith.constant dense<0.000000e+00> : vector<128xf32>
    %14 = vector.multi_reduction <add>, %13, %cst_6 [0] : vector<64x128xf32> to vector<128xf32>
    %15 = vector.shape_cast %14 : vector<128xf32> to vector<1x128xf32>
    %16 = vector.broadcast %1 : f32 to vector<1x128xf32>
    %17 = arith.addf %15, %16 : vector<1x128xf32>
    %cst_7 = arith.constant 0.000000e+00 : f32
    %18 = vector.broadcast %cst_7 : f32 to vector<1x128xf32>
    %19 = arith.subf %18, %17 : vector<1x128xf32>
    %20 = math.exp %19 : vector<1x128xf32>
    %cst_8 = arith.constant 1.000000e+00 : f32
    %21 = vector.broadcast %cst_8 : f32 to vector<1x128xf32>
    %22 = arith.addf %21, %20 : vector<1x128xf32>
    %cst_9 = arith.constant 1.000000e+00 : f32
    %23 = vector.broadcast %cst_9 : f32 to vector<1x128xf32>
    %24 = arith.divf %23, %22 : vector<1x128xf32>
    %c0_10 = arith.constant 0 : index
    %25 = arith.index_cast %3 : i32 to index
    %26 = vector.load %arg5[%c0_10, %25] : memref<1x512xf32, #tpu.memory_space<vmem>>, vector<1x128xf32>
    tpu.vector_store %arg5[%c0_10, %25], %24 {strides = array<i32>} : memref<1x512xf32, #tpu.memory_space<vmem>>, vector<1x128xf32>,
    %c1_i32 = arith.constant 1 : i32
    %c128_i32_11 = arith.constant 128 : i32
    %27 = arith.muli %c1_i32, %c128_i32_11 : i32
    %28 = tpu.assume_multiple %27, 128 : i32
    %c0_12 = arith.constant 0 : index
    %29 = arith.index_cast %28 : i32 to index
    %30 = vector.load %arg2[%c0_12, %29] : memref<320x512xf32, #tpu.memory_space<vmem>>, vector<320x128xf32>
    %c0_13 = arith.constant 0 : index
    %c0_14 = arith.constant 0 : index
    %31 = vector.load %arg3[%c0_13, %c0_14] : memref<64x320xf32, #tpu.memory_space<vmem>>, vector<64x320xf32>
    %cst_15 = arith.constant dense<0.000000e+00> : vector<64x128xf32>
    %32 = tpu.matmul %31, %30, %cst_15 {dimension_numbers = #tpu.dot_dimension_numbers<[1], [0], [0], [1], [0, 0, 1, 1], [], []>} : vector<64x320xf32>, vector<320x128xf32>, vector<64x128xf32> -> vector<64x128xf32>
    %33 = vector.broadcast %0 : f32 to vector<64x128xf32>
    %34 = arith.addf %32, %33 : vector<64x128xf32>
    %cst_16 = arith.constant 0.000000e+00 : f32
    %35 = vector.broadcast %cst_16 : f32 to vector<64x128xf32>
    %36 = arith.maximumf %34, %35 : vector<64x128xf32>
    %c0_17 = arith.constant 0 : index
    %c0_18 = arith.constant 0 : index
    %37 = vector.load %arg4[%c0_17, %c0_18] : memref<64x128xf32, #tpu.memory_space<vmem>>, vector<64x128xf32>
    %38 = arith.mulf %36, %37 : vector<64x128xf32>
    %cst_19 = arith.constant dense<0.000000e+00> : vector<128xf32>
    %39 = vector.multi_reduction <add>, %38, %cst_19 [0] : vector<64x128xf32> to vector<128xf32>
    %40 = vector.shape_cast %39 : vector<128xf32> to vector<1x128xf32>
    %41 = vector.broadcast %1 : f32 to vector<1x128xf32>
    %42 = arith.addf %40, %41 : vector<1x128xf32>
    %cst_20 = arith.constant 0.000000e+00 : f32
    %43 = vector.broadcast %cst_20 : f32 to vector<1x128xf32>
    %44 = arith.subf %43, %42 : vector<1x128xf32>
    %45 = math.exp %44 : vector<1x128xf32>
    %cst_21 = arith.constant 1.000000e+00 : f32
    %46 = vector.broadcast %cst_21 : f32 to vector<1x128xf32>
    %47 = arith.addf %46, %45 : vector<1x128xf32>
    %cst_22 = arith.constant 1.000000e+00 : f32
    %48 = vector.broadcast %cst_22 : f32 to vector<1x128xf32>
    %49 = arith.divf %48, %47 : vector<1x128xf32>
    %c0_23 = arith.constant 0 : index
    %50 = arith.index_cast %28 : i32 to index
    %51 = vector.load %arg5[%c0_23, %50] : memref<1x512xf32, #tpu.memory_space<vmem>>, vector<1x128xf32>
    tpu.vector_store %arg5[%c0_23, %50], %49 {strides = array<i32>} : memref<1x512xf32, #tpu.memory_space<vmem>>, vector<1x128xf32>,
    %c2_i32 = arith.constant 2 : i32
    %c128_i32_24 = arith.constant 128 : i32
    %52 = arith.muli %c2_i32, %c128_i32_24 : i32
    %53 = tpu.assume_multiple %52, 128 : i32
    %c0_25 = arith.constant 0 : index
    %54 = arith.index_cast %53 : i32 to index
    %55 = vector.load %arg2[%c0_25, %54] : memref<320x512xf32, #tpu.memory_space<vmem>>, vector<320x128xf32>
    %c0_26 = arith.constant 0 : index
    %c0_27 = arith.constant 0 : index
    %56 = vector.load %arg3[%c0_26, %c0_27] : memref<64x320xf32, #tpu.memory_space<vmem>>, vector<64x320xf32>
    %cst_28 = arith.constant dense<0.000000e+00> : vector<64x128xf32>
    %57 = tpu.matmul %56, %55, %cst_28 {dimension_numbers = #tpu.dot_dimension_numbers<[1], [0], [0], [1], [0, 0, 1, 1], [], []>} : vector<64x320xf32>, vector<320x128xf32>, vector<64x128xf32> -> vector<64x128xf32>
    %58 = vector.broadcast %0 : f32 to vector<64x128xf32>
    %59 = arith.addf %57, %58 : vector<64x128xf32>
    %cst_29 = arith.constant 0.000000e+00 : f32
    %60 = vector.broadcast %cst_29 : f32 to vector<64x128xf32>
    %61 = arith.maximumf %59, %60 : vector<64x128xf32>
    %c0_30 = arith.constant 0 : index
    %c0_31 = arith.constant 0 : index
    %62 = vector.load %arg4[%c0_30, %c0_31] : memref<64x128xf32, #tpu.memory_space<vmem>>, vector<64x128xf32>
    %63 = arith.mulf %61, %62 : vector<64x128xf32>
    %cst_32 = arith.constant dense<0.000000e+00> : vector<128xf32>
    %64 = vector.multi_reduction <add>, %63, %cst_32 [0] : vector<64x128xf32> to vector<128xf32>
    %65 = vector.shape_cast %64 : vector<128xf32> to vector<1x128xf32>
    %66 = vector.broadcast %1 : f32 to vector<1x128xf32>
    %67 = arith.addf %65, %66 : vector<1x128xf32>
    %cst_33 = arith.constant 0.000000e+00 : f32
    %68 = vector.broadcast %cst_33 : f32 to vector<1x128xf32>
    %69 = arith.subf %68, %67 : vector<1x128xf32>
    %70 = math.exp %69 : vector<1x128xf32>
    %cst_34 = arith.constant 1.000000e+00 : f32
    %71 = vector.broadcast %cst_34 : f32 to vector<1x128xf32>
    %72 = arith.addf %71, %70 : vector<1x128xf32>
    %cst_35 = arith.constant 1.000000e+00 : f32
    %73 = vector.broadcast %cst_35 : f32 to vector<1x128xf32>
    %74 = arith.divf %73, %72 : vector<1x128xf32>
    %c0_36 = arith.constant 0 : index
    %75 = arith.index_cast %53 : i32 to index
    %76 = vector.load %arg5[%c0_36, %75] : memref<1x512xf32, #tpu.memory_space<vmem>>, vector<1x128xf32>
    tpu.vector_store %arg5[%c0_36, %75], %74 {strides = array<i32>} : memref<1x512xf32, #tpu.memory_space<vmem>>, vector<1x128xf32>,
    %c3_i32 = arith.constant 3 : i32
    %c128_i32_37 = arith.constant 128 : i32
    %77 = arith.muli %c3_i32, %c128_i32_37 : i32
    %78 = tpu.assume_multiple %77, 128 : i32
    %c0_38 = arith.constant 0 : index
    %79 = arith.index_cast %78 : i32 to index
    %80 = vector.load %arg2[%c0_38, %79] : memref<320x512xf32, #tpu.memory_space<vmem>>, vector<320x128xf32>
    %c0_39 = arith.constant 0 : index
    %c0_40 = arith.constant 0 : index
    %81 = vector.load %arg3[%c0_39, %c0_40] : memref<64x320xf32, #tpu.memory_space<vmem>>, vector<64x320xf32>
    %cst_41 = arith.constant dense<0.000000e+00> : vector<64x128xf32>
    %82 = tpu.matmul %81, %80, %cst_41 {dimension_numbers = #tpu.dot_dimension_numbers<[1], [0], [0], [1], [0, 0, 1, 1], [], []>} : vector<64x320xf32>, vector<320x128xf32>, vector<64x128xf32> -> vector<64x128xf32>
    %83 = vector.broadcast %0 : f32 to vector<64x128xf32>
    %84 = arith.addf %82, %83 : vector<64x128xf32>
    %cst_42 = arith.constant 0.000000e+00 : f32
    %85 = vector.broadcast %cst_42 : f32 to vector<64x128xf32>
    %86 = arith.maximumf %84, %85 : vector<64x128xf32>
    %c0_43 = arith.constant 0 : index
    %c0_44 = arith.constant 0 : index
    %87 = vector.load %arg4[%c0_43, %c0_44] : memref<64x128xf32, #tpu.memory_space<vmem>>, vector<64x128xf32>
    %88 = arith.mulf %86, %87 : vector<64x128xf32>
    %cst_45 = arith.constant dense<0.000000e+00> : vector<128xf32>
    %89 = vector.multi_reduction <add>, %88, %cst_45 [0] : vector<64x128xf32> to vector<128xf32>
    %90 = vector.shape_cast %89 : vector<128xf32> to vector<1x128xf32>
    %91 = vector.broadcast %1 : f32 to vector<1x128xf32>
    %92 = arith.addf %90, %91 : vector<1x128xf32>
    %cst_46 = arith.constant 0.000000e+00 : f32
    %93 = vector.broadcast %cst_46 : f32 to vector<1x128xf32>
    %94 = arith.subf %93, %92 : vector<1x128xf32>
    %95 = math.exp %94 : vector<1x128xf32>
    %cst_47 = arith.constant 1.000000e+00 : f32
    %96 = vector.broadcast %cst_47 : f32 to vector<1x128xf32>
    %97 = arith.addf %96, %95 : vector<1x128xf32>
    %cst_48 = arith.constant 1.000000e+00 : f32
    %98 = vector.broadcast %cst_48 : f32 to vector<1x128xf32>
    %99 = arith.divf %98, %97 : vector<1x128xf32>
    %c0_49 = arith.constant 0 : index
    %100 = arith.index_cast %78 : i32 to index
    %101 = vector.load %arg5[%c0_49, %100] : memref<1x512xf32, #tpu.memory_space<vmem>>, vector<1x128xf32>
    tpu.vector_store %arg5[%c0_49, %100], %99 {strides = array<i32>} : memref<1x512xf32, #tpu.memory_space<vmem>>, vector<1x128xf32>,
    %c4_i32 = arith.constant 4 : i32
    return
  }
  func.func @transform_0(%arg0: i32) -> i32 {
    %c0_i32 = arith.constant 0 : i32
    %c0_i32_0 = arith.constant 0 : i32
    return %c0_i32 : i32
  }
  func.func @transform_1(%arg0: i32) -> (i32, i32) {
    %c0_i32 = arith.constant 0 : i32
    %c0_i32_0 = arith.constant 0 : i32
    return %c0_i32, %arg0 : i32, i32
  }
  func.func @transform_2(%arg0: i32) -> (i32, i32) {
    %c0_i32 = arith.constant 0 : i32
    %c0_i32_0 = arith.constant 0 : i32
    %c0_i32_1 = arith.constant 0 : i32
    return %c0_i32, %c0_i32_0 : i32, i32
  }
  func.func @transform_3(%arg0: i32) -> (i32, i32) {
    %c0_i32 = arith.constant 0 : i32
    %c0_i32_0 = arith.constant 0 : i32
    %c0_i32_1 = arith.constant 0 : i32
    return %c0_i32, %c0_i32_0 : i32, i32
  }
  func.func @transform_4(%arg0: i32) -> (i32, i32) {
    %c0_i32 = arith.constant 0 : i32
    %c0_i32_0 = arith.constant 0 : i32
    return %c0_i32, %arg0 : i32, i32
  }
}

</mosaic_0001>

<bundles_post_ra>
// kernel: net3_forward.1
= control target key start
LH: loop header
LB: loop body
LE: loop exit
PB: predicated region body
PF: predicated region fallthrough
CT: control target
= control target key end

     0   :  { %9 = vsyncpa [#allocation3], 0  ;;  %s2696_s15 = smov 0   ;;  %s2698_s16 = smov 0   ;;  %s3644_s0 = inlined_call_operand.vmem [shape: f32[2], index: 0, kind: input, shape index: {}]   ;;  %s3645_s1 = inlined_call_operand.vmem [shape: f32[320,1536], index: 1, kind: input, shape index: {}]   ;;  %s3646_s2 = inlined_call_operand.vmem [shape: f32[64,320], index: 2, kind: input, shape index: {}]   ;;  %s3647_s3 = inlined_call_operand.vmem [shape: f32[64,128], index: 3, kind: input, shape index: {}]   ;;  %s3648_s4 = inlined_call_operand.vmem [shape: f32[1,1536], index: 4, kind: output, shape index: {}]  }
   0x1   :  { %s2700_s17 = smov 0  }
   0x2 LB: > { %s2005_s18 = sadd.s32 4294967295, %s2668_s17   ;;  %s2713_s19 = sadd.s32 1, %s2668_s17   ;;  %s2668_s17 = sphi %s2700_s17, %s3656_s17   ;;  %s2664_s16 = sphi %s2698_s16, %s3655_s16   ;;  %s2660_s15 = sphi %s2696_s15, %s3654_s15  }
   0x3   : > { %s40_s20 = ssub.s32 %s2668_s17, %s2713_s19  ;;  %s43_s21 = sadd.s32 1, %s2664_s16 }
   0x4   : > { %p41_p0 = scmp.eq.s32.totalorder %s40_s20, 0  ;;  %p50_p1 = scmp.ne.s32.totalorder %s2664_s16, %s2660_s15 }
   0x5   : > { %p51_p2 = scmp.eq.s32.totalorder %s2668_s17, 0  ;;  %p2007_p3 = scmp.ge.s32.totalorder %s2668_s17, 1 }
   0x6   : > { %s2723_s22 = scalar_select %p41_p0, %s2664_s16, %s43_s21  }
   0x7   : > { %p2725_p4 = por %p51_p2, %p50_p1  ;;  %p135_p5 = scmp.lt.s32.totalorder %s2668_s17, 4 }
   0x8   : > { %p2732_p6 = scmp.eq.s32.totalorder %s2005_s18, 0  ;;  %s148_s28 = sshll.u32 %s3644_s0, 4  ;;  %s149_s28 = int_to_ptr.vmem [resolvable:$true] %s148_s28 }
   0x9   : > { %p2736_p7 = pnand %p2007_p3, %p135_p5  ;;  %s2627_s29 = scalar_lea.vmem %s149_s28, 16 }
   0xa   : > { %p2628_p10 = scmp.ne.s32.totalorder %s149_s28, %s2627_s29  ;;  %p2635_p0 = scmp.lt.s32.totalorder %s149_s28, %s149_s28 }
   0xb   : > { %p2580_p8 = pneg %p2736_p7  ;;  %p2636_p1 = scmp.lt.s32.totalorder %s2627_s29, %s2627_s29 }
   0xd   : > { %p2581_p9 = pnand %p2732_p6, %p2580_p8  ;;  %p2637_p2 = por %p2636_p1, %p2635_p0 }
   0xf   : > { %p2629_p11 = pneg %p2581_p9 }
  0x11   : > { %p2630_p12 = pnand %p2629_p11, %p2628_p10 }
  0x13   : > { %p2631_p13 = pneg %p2630_p12 }
  0x15   : > { %p2638_p3 = pnand %p2637_p2, %p2631_p13 }
  0x17   : > { %2641 = shalt.err (!%p2638_p3)
}
  0x18   : > { %s2670_s30 = smov [#allocation2]   ;;  %p2009_p5 = scmp.ge.s32.totalorder %s2668_s17, 3 }
  0x19   : > { %2583 = dma.vmem_to_smem (!%p2581_p9), %s149_s28, 16, %s2670_s30, [#allocation3]  }
  0x1a   : > { %161 = sbr.rel (%p2009_p5) target bundleno = 116 (0x74), region = 28 }
  0x1f   : > { %164 = sbr.rel (!%p2725_p4) target bundleno = 116 (0x74), region = 32  ;;  %s166_s5 = sand.u32 (%p2725_p4), 1, %s2664_s16  }
  0x20   : > { %s2173_s6 = sshll.u32 (%p2725_p4), %s2668_s17, 5  ;;  %s2574_s7 = smul.u32 (%p2725_p4), 1280, %s166_s5 }
  0x21   : > { %s2755_s10 = scalar_lea.vmem (%p2725_p4), %s3645_s1, %s2173_s6 }
  0x22   : > { %v184_v0 = vld [vmem:[%s2755_s10] sm:$0xff] (%p2725_p4)  ;;  %v186_v1 = vld [vmem:[%s2755_s10 + $0x8] sm:$0xff] (%p2725_p4)  ;;  %v188_v2 = vld [vmem:[%s2755_s10 + $0x10] sm:$0xff] (%p2725_p4)  ;;  %s2763_s11 = scalar_lea.vmem (%p2725_p4), [#allocation4], %s2574_s7 }
  0x23   : > { %v190_v3 = vld [vmem:[%s2755_s10 + $0x18] sm:$0xff] (%p2725_p4)  ;;  %v192_v4 = vld [vmem:[%s2755_s10 + $0x60] sm:$0xff] (%p2725_p4)  ;;  %v194_v5 = vld [vmem:[%s2755_s10 + $0x68] sm:$0xff] (%p2725_p4)  ;;  %185 = vst [vmem:[%s2763_s11] sm:$0xff] (%p2725_p4), %v184_v0 }
  0x24   : > { %187 = vst [vmem:[%s2763_s11 + $0x8] sm:$0xff] %v186_v1  ;;  %189 = vst [vmem:[%s2763_s11 + $0x10] sm:$0xff] %v188_v2  ;;  %v196_v6 = vld [vmem:[%s2755_s10 + $0x70] sm:$0xff]  ;;  %v198_v7 = vld [vmem:[%s2755_s10 + $0x78] sm:$0xff] }
  0x25   : > { %191 = vst [vmem:[%s2763_s11 + $0x18] sm:$0xff] %v190_v3  ;;  %193 = vst [vmem:[%s2763_s11 + $0x20] sm:$0xff] %v192_v4  ;;  %v200_v8 = vld [vmem:[%s2755_s10 + $0xc0] sm:$0xff]  ;;  %v202_v9 = vld [vmem:[%s2755_s10 + $0xc8] sm:$0xff] }
  0x26   : > { %195 = vst [vmem:[%s2763_s11 + $0x28] sm:$0xff] %v194_v5  ;;  %197 = vst [vmem:[%s2763_s11 + $0x30] sm:$0xff] %v196_v6  ;;  %v204_v10 = vld [vmem:[%s2755_s10 + $0xd0] sm:$0xff]  ;;  %v206_v11 = vld [vmem:[%s2755_s10 + $0xd8] sm:$0xff] }
  0x27   : > { %199 = vst [vmem:[%s2763_s11 + $0x38] sm:$0xff] %v198_v7  ;;  %201 = vst [vmem:[%s2763_s11 + $0x40] sm:$0xff] %v200_v8  ;;  %v208_v12 = vld [vmem:[%s2755_s10 + $0x120] sm:$0xff]  ;;  %v210_v13 = vld [vmem:[%s2755_s10 + $0x128] sm:$0xff] }
  0x28   : > { %203 = vst [vmem:[%s2763_s11 + $0x48] sm:$0xff] %v202_v9  ;;  %205 = vst [vmem:[%s2763_s11 + $0x50] sm:$0xff] %v204_v10  ;;  %v212_v14 = vld [vmem:[%s2755_s10 + $0x130] sm:$0xff]  ;;  %v214_v15 = vld [vmem:[%s2755_s10 + $0x138] sm:$0xff] }
  0x29   : > { %207 = vst [vmem:[%s2763_s11 + $0x58] sm:$0xff] %v206_v11  ;;  %209 = vst [vmem:[%s2763_s11 + $0x60] sm:$0xff] %v208_v12  ;;  %v216_v16 = vld [vmem:[%s2755_s10 + $0x180] sm:$0xff]  ;;  %v218_v17 = vld [vmem:[%s2755_s10 + $0x188] sm:$0xff] }
  0x2a   : > { %211 = vst [vmem:[%s2763_s11 + $0x68] sm:$0xff] %v210_v13  ;;  %213 = vst [vmem:[%s2763_s11 + $0x70] sm:$0xff] %v212_v14  ;;  %v220_v18 = vld [vmem:[%s2755_s10 + $0x190] sm:$0xff]  ;;  %v222_v19 = vld [vmem:[%s2755_s10 + $0x198] sm:$0xff] }
  0x2b   : > { %215 = vst [vmem:[%s2763_s11 + $0x78] sm:$0xff] %v214_v15  ;;  %217 = vst [vmem:[%s2763_s11 + $0x80] sm:$0xff] %v216_v16  ;;  %v224_v20 = vld [vmem:[%s2755_s10 + $0x1e0] sm:$0xff]  ;;  %v226_v21 = vld [vmem:[%s2755_s10 + $0x1e8] sm:$0xff] }
  0x2c   : > { %219 = vst [vmem:[%s2763_s11 + $0x88] sm:$0xff] %v218_v17  ;;  %221 = vst [vmem:[%s2763_s11 + $0x90] sm:$0xff] %v220_v18  ;;  %v228_v22 = vld [vmem:[%s2755_s10 + $0x1f0] sm:$0xff]  ;;  %v230_v23 = vld [vmem:[%s2755_s10 + $0x1f8] sm:$0xff] }
  0x2d   : > { %223 = vst [vmem:[%s2763_s11 + $0x98] sm:$0xff] %v222_v19  ;;  %225 = vst [vmem:[%s2763_s11 + $0xa0] sm:$0xff] %v224_v20  ;;  %v232_v24 = vld [vmem:[%s2755_s10 + $0x240] sm:$0xff]  ;;  %v234_v25 = vld [vmem:[%s2755_s10 + $0x248] sm:$0xff] }
  0x2e   : > { %227 = vst [vmem:[%s2763_s11 + $0xa8] sm:$0xff] %v226_v21  ;;  %229 = vst [vmem:[%s2763_s11 + $0xb0] sm:$0xff] %v228_v22  ;;  %v236_v26 = vld [vmem:[%s2755_s10 + $0x250] sm:$0xff]  ;;  %v238_v27 = vld [vmem:[%s2755_s10 + $0x258] sm:$0xff] }
  0x2f   : > { %231 = vst [vmem:[%s2763_s11 + $0xb8] sm:$0xff] %v230_v23  ;;  %233 = vst [vmem:[%s2763_s11 + $0xc0] sm:$0xff] %v232_v24  ;;  %v240_v28 = vld [vmem:[%s2755_s10 + $0x2a0] sm:$0xff]  ;;  %v242_v29 = vld [vmem:[%s2755_s10 + $0x2a8] sm:$0xff] }
  0x30   : > { %235 = vst [vmem:[%s2763_s11 + $0xc8] sm:$0xff] %v234_v25  ;;  %237 = vst [vmem:[%s2763_s11 + $0xd0] sm:$0xff] %v236_v26  ;;  %v244_v30 = vld [vmem:[%s2755_s10 + $0x2b0] sm:$0xff]  ;;  %v246_v31 = vld [vmem:[%s2755_s10 + $0x2b8] sm:$0xff] }
  0x31   : > { %239 = vst [vmem:[%s2763_s11 + $0xd8] sm:$0xff] %v238_v27  ;;  %241 = vst [vmem:[%s2763_s11 + $0xe0] sm:$0xff] %v240_v28  ;;  %v248_v32 = vld [vmem:[%s2755_s10 + $0x300] sm:$0xff]  ;;  %v250_v33 = vld [vmem:[%s2755_s10 + $0x308] sm:$0xff] }
  0x32   : > { %243 = vst [vmem:[%s2763_s11 + $0xe8] sm:$0xff] %v242_v29  ;;  %245 = vst [vmem:[%s2763_s11 + $0xf0] sm:$0xff] %v244_v30  ;;  %v252_v34 = vld [vmem:[%s2755_s10 + $0x310] sm:$0xff]  ;;  %v254_v35 = vld [vmem:[%s2755_s10 + $0x318] sm:$0xff] }
  0x33   : > { %247 = vst [vmem:[%s2763_s11 + $0xf8] sm:$0xff] %v246_v31  ;;  %249 = vst [vmem:[%s2763_s11 + $0x100] sm:$0xff] %v248_v32  ;;  %v256_v36 = vld [vmem:[%s2755_s10 + $0x360] sm:$0xff]  ;;  %v258_v37 = vld [vmem:[%s2755_s10 + $0x368] sm:$0xff] }
  0x34   : > { %251 = vst [vmem:[%s2763_s11 + $0x108] sm:$0xff] %v250_v33  ;;  %253 = vst [vmem:[%s2763_s11 + $0x110] sm:$0xff] %v252_v34  ;;  %v260_v38 = vld [vmem:[%s2755_s10 + $0x370] sm:$0xff]  ;;  %v262_v39 = vld [vmem:[%s2755_s10 + $0x378] sm:$0xff] }
  0x35   : > { %255 = vst [vmem:[%s2763_s11 + $0x118] sm:$0xff] %v254_v35  ;;  %257 = vst [vmem:[%s2763_s11 + $0x120] sm:$0xff] %v256_v36  ;;  %v264_v40 = vld [vmem:[%s2755_s10 + $0x3c0] sm:$0xff]  ;;  %v266_v41 = vld [vmem:[%s2755_s10 + $0x3c8] sm:$0xff] }
  0x36   : > { %259 = vst [vmem:[%s2763_s11 + $0x128] sm:$0xff] %v258_v37  ;;  %261 = vst [vmem:[%s2763_s11 + $0x130] sm:$0xff] %v260_v38  ;;  %v268_v42 = vld [vmem:[%s2755_s10 + $0x3d0] sm:$0xff]  ;;  %v270_v43 = vld [vmem:[%s2755_s10 + $0x3d8] sm:$0xff] }
  0x37   : > { %263 = vst [vmem:[%s2763_s11 + $0x138] sm:$0xff] %v262_v39  ;;  %265 = vst [vmem:[%s2763_s11 + $0x140] sm:$0xff] %v264_v40  ;;  %v272_v44 = vld [vmem:[%s2755_s10 + $0x420] sm:$0xff]  ;;  %v274_v45 = vld [vmem:[%s2755_s10 + $0x428] sm:$0xff] }
  0x38   : > { %267 = vst [vmem:[%s2763_s11 + $0x148] sm:$0xff] %v266_v41  ;;  %269 = vst [vmem:[%s2763_s11 + $0x150] sm:$0xff] %v268_v42  ;;  %v276_v46 = vld [vmem:[%s2755_s10 + $0x430] sm:$0xff]  ;;  %v278_v47 = vld [vmem:[%s2755_s10 + $0x438] sm:$0xff] }
  0x39   : > { %271 = vst [vmem:[%s2763_s11 + $0x158] sm:$0xff] %v270_v43  ;;  %273 = vst [vmem:[%s2763_s11 + $0x160] sm:$0xff] %v272_v44  ;;  %v280_v48 = vld [vmem:[%s2755_s10 + $0x480] sm:$0xff]  ;;  %v282_v49 = vld [vmem:[%s2755_s10 + $0x488] sm:$0xff] }
  0x3a   : > { %275 = vst [vmem:[%s2763_s11 + $0x168] sm:$0xff] %v274_v45  ;;  %277 = vst [vmem:[%s2763_s11 + $0x170] sm:$0xff] %v276_v46  ;;  %v284_v50 = vld [vmem:[%s2755_s10 + $0x490] sm:$0xff]  ;;  %v286_v51 = vld [vmem:[%s2755_s10 + $0x498] sm:$0xff] }
  0x3b   : > { %279 = vst [vmem:[%s2763_s11 + $0x178] sm:$0xff] %v278_v47  ;;  %281 = vst [vmem:[%s2763_s11 + $0x180] sm:$0xff] %v280_v48  ;;  %v288_v52 = vld [vmem:[%s2755_s10 + $0x4e0] sm:$0xff]  ;;  %v290_v53 = vld [vmem:[%s2755_s10 + $0x4e8] sm:$0xff] }
  0x3c   : > { %283 = vst [vmem:[%s2763_s11 + $0x188] sm:$0xff] %v282_v49  ;;  %285 = vst [vmem:[%s2763_s11 + $0x190] sm:$0xff] %v284_v50  ;;  %v292_v54 = vld [vmem:[%s2755_s10 + $0x4f0] sm:$0xff]  ;;  %v294_v55 = vld [vmem:[%s2755_s10 + $0x4f8] sm:$0xff] }
  0x3d   : > { %287 = vst [vmem:[%s2763_s11 + $0x198] sm:$0xff] %v286_v51  ;;  %289 = vst [vmem:[%s2763_s11 + $0x1a0] sm:$0xff] %v288_v52  ;;  %v296_v56 = vld [vmem:[%s2755_s10 + $0x540] sm:$0xff]  ;;  %v298_v57 = vld [vmem:[%s2755_s10 + $0x548] sm:$0xff] }
  0x3e   : > { %291 = vst [vmem:[%s2763_s11 + $0x1a8] sm:$0xff] %v290_v53  ;;  %293 = vst [vmem:[%s2763_s11 + $0x1b0] sm:$0xff] %v292_v54  ;;  %v300_v58 = vld [vmem:[%s2755_s10 + $0x550] sm:$0xff]  ;;  %v302_v59 = vld [vmem:[%s2755_s10 + $0x558] sm:$0xff] }
  0x3f   : > { %295 = vst [vmem:[%s2763_s11 + $0x1b8] sm:$0xff] %v294_v55  ;;  %297 = vst [vmem:[%s2763_s11 + $0x1c0] sm:$0xff] %v296_v56  ;;  %v304_v60 = vld [vmem:[%s2755_s10 + $0x5a0] sm:$0xff]  ;;  %v306_v61 = vld [vmem:[%s2755_s10 + $0x5a8] sm:$0xff] }
  0x40   : > { %299 = vst [vmem:[%s2763_s11 + $0x1c8] sm:$0xff] %v298_v57  ;;  %301 = vst [vmem:[%s2763_s11 + $0x1d0] sm:$0xff] %v300_v58  ;;  %v308_v62 = vld [vmem:[%s2755_s10 + $0x5b0] sm:$0xff]  ;;  %v310_v63 = vld [vmem:[%s2755_s10 + $0x5b8] sm:$0xff] }
  0x41   : > { %303 = vst [vmem:[%s2763_s11 + $0x1d8] sm:$0xff] %v302_v59  ;;  %305 = vst [vmem:[%s2763_s11 + $0x1e0] sm:$0xff] %v304_v60  ;;  %v312_v0 = vld [vmem:[%s2755_s10 + $0x600] sm:$0xff]  ;;  %v314_v1 = vld [vmem:[%s2755_s10 + $0x608] sm:$0xff] }
  0x42   : > { %307 = vst [vmem:[%s2763_s11 + $0x1e8] sm:$0xff] %v306_v61  ;;  %309 = vst [vmem:[%s2763_s11 + $0x1f0] sm:$0xff] %v308_v62  ;;  %v316_v2 = vld [vmem:[%s2755_s10 + $0x610] sm:$0xff]  ;;  %v318_v3 = vld [vmem:[%s2755_s10 + $0x618] sm:$0xff] }
  0x43   : > { %311 = vst [vmem:[%s2763_s11 + $0x1f8] sm:$0xff] %v310_v63  ;;  %313 = vst [vmem:[%s2763_s11 + $0x200] sm:$0xff] %v312_v0  ;;  %v320_v4 = vld [vmem:[%s2755_s10 + $0x660] sm:$0xff]  ;;  %v322_v5 = vld [vmem:[%s2755_s10 + $0x668] sm:$0xff] }
  0x44   : > { %315 = vst [vmem:[%s2763_s11 + $0x208] sm:$0xff] %v314_v1  ;;  %317 = vst [vmem:[%s2763_s11 + $0x210] sm:$0xff] %v316_v2  ;;  %v324_v6 = vld [vmem:[%s2755_s10 + $0x670] sm:$0xff]  ;;  %v326_v7 = vld [vmem:[%s2755_s10 + $0x678] sm:$0xff] }
  0x45   : > { %319 = vst [vmem:[%s2763_s11 + $0x218] sm:$0xff] %v318_v3  ;;  %321 = vst [vmem:[%s2763_s11 + $0x220] sm:$0xff] %v320_v4  ;;  %v328_v8 = vld [vmem:[%s2755_s10 + $0x6c0] sm:$0xff]  ;;  %v330_v9 = vld [vmem:[%s2755_s10 + $0x6c8] sm:$0xff] }
  0x46   : > { %323 = vst [vmem:[%s2763_s11 + $0x228] sm:$0xff] %v322_v5  ;;  %325 = vst [vmem:[%s2763_s11 + $0x230] sm:$0xff] %v324_v6  ;;  %v332_v10 = vld [vmem:[%s2755_s10 + $0x6d0] sm:$0xff]  ;;  %v334_v11 = vld [vmem:[%s2755_s10 + $0x6d8] sm:$0xff] }
  0x47   : > { %327 = vst [vmem:[%s2763_s11 + $0x238] sm:$0xff] %v326_v7  ;;  %329 = vst [vmem:[%s2763_s11 + $0x240] sm:$0xff] %v328_v8  ;;  %v336_v12 = vld [vmem:[%s2755_s10 + $0x720] sm:$0xff]  ;;  %v338_v13 = vld [vmem:[%s2755_s10 + $0x728] sm:$0xff] }
  0x48   : > { %331 = vst [vmem:[%s2763_s11 + $0x248] sm:$0xff] %v330_v9  ;;  %333 = vst [vmem:[%s2763_s11 + $0x250] sm:$0xff] %v332_v10  ;;  %v340_v14 = vld [vmem:[%s2755_s10 + $0x730] sm:$0xff]  ;;  %v342_v15 = vld [vmem:[%s2755_s10 + $0x738] sm:$0xff] }
  0x49   : > { %335 = vst [vmem:[%s2763_s11 + $0x258] sm:$0xff] %v334_v11  ;;  %337 = vst [vmem:[%s2763_s11 + $0x260] sm:$0xff] %v336_v12  ;;  %v344_v16 = vld [vmem:[%s2755_s10 + $0x780] sm:$0xff]  ;;  %v346_v17 = vld [vmem:[%s2755_s10 + $0x788] sm:$0xff] }
  0x4a   : > { %339 = vst [vmem:[%s2763_s11 + $0x268] sm:$0xff] %v338_v13  ;;  %341 = vst [vmem:[%s2763_s11 + $0x270] sm:$0xff] %v340_v14  ;;  %v348_v18 = vld [vmem:[%s2755_s10 + $0x790] sm:$0xff]  ;;  %v350_v19 = vld [vmem:[%s2755_s10 + $0x798] sm:$0xff] }
  0x4b   : > { %343 = vst [vmem:[%s2763_s11 + $0x278] sm:$0xff] %v342_v15  ;;  %345 = vst [vmem:[%s2763_s11 + $0x280] sm:$0xff] %v344_v16  ;;  %v352_v20 = vld [vmem:[%s2755_s10 + $0x7e0] sm:$0xff]  ;;  %v354_v21 = vld [vmem:[%s2755_s10 + $0x7e8] sm:$0xff] }
  0x4c   : > { %347 = vst [vmem:[%s2763_s11 + $0x288] sm:$0xff] %v346_v17  ;;  %349 = vst [vmem:[%s2763_s11 + $0x290] sm:$0xff] %v348_v18  ;;  %v356_v22 = vld [vmem:[%s2755_s10 + $0x7f0] sm:$0xff]  ;;  %v358_v23 = vld [vmem:[%s2755_s10 + $0x7f8] sm:$0xff] }
  0x4d   : > { %351 = vst [vmem:[%s2763_s11 + $0x298] sm:$0xff] %v350_v19  ;;  %353 = vst [vmem:[%s2763_s11 + $0x2a0] sm:$0xff] %v352_v20  ;;  %v360_v24 = vld [vmem:[%s2755_s10 + $0x840] sm:$0xff]  ;;  %v362_v25 = vld [vmem:[%s2755_s10 + $0x848] sm:$0xff] }
  0x4e   : > { %355 = vst [vmem:[%s2763_s11 + $0x2a8] sm:$0xff] %v354_v21  ;;  %357 = vst [vmem:[%s2763_s11 + $0x2b0] sm:$0xff] %v356_v22  ;;  %v364_v26 = vld [vmem:[%s2755_s10 + $0x850] sm:$0xff]  ;;  %v366_v27 = vld [vmem:[%s2755_s10 + $0x858] sm:$0xff] }
  0x4f   : > { %359 = vst [vmem:[%s2763_s11 + $0x2b8] sm:$0xff] %v358_v23  ;;  %361 = vst [vmem:[%s2763_s11 + $0x2c0] sm:$0xff] %v360_v24  ;;  %v368_v28 = vld [vmem:[%s2755_s10 + $0x8a0] sm:$0xff]  ;;  %v370_v29 = vld [vmem:[%s2755_s10 + $0x8a8] sm:$0xff] }
  0x50   : > { %363 = vst [vmem:[%s2763_s11 + $0x2c8] sm:$0xff] %v362_v25  ;;  %365 = vst [vmem:[%s2763_s11 + $0x2d0] sm:$0xff] %v364_v26  ;;  %v372_v30 = vld [vmem:[%s2755_s10 + $0x8b0] sm:$0xff]  ;;  %v374_v31 = vld [vmem:[%s2755_s10 + $0x8b8] sm:$0xff] }
  0x51   : > { %367 = vst [vmem:[%s2763_s11 + $0x2d8] sm:$0xff] %v366_v27  ;;  %369 = vst [vmem:[%s2763_s11 + $0x2e0] sm:$0xff] %v368_v28  ;;  %v376_v32 = vld [vmem:[%s2755_s10 + $0x900] sm:$0xff]  ;;  %v378_v33 = vld [vmem:[%s2755_s10 + $0x908] sm:$0xff] }
  0x52   : > { %371 = vst [vmem:[%s2763_s11 + $0x2e8] sm:$0xff] %v370_v29  ;;  %373 = vst [vmem:[%s2763_s11 + $0x2f0] sm:$0xff] %v372_v30  ;;  %v380_v34 = vld [vmem:[%s2755_s10 + $0x910] sm:$0xff]  ;;  %v382_v35 = vld [vmem:[%s2755_s10 + $0x918] sm:$0xff] }
  0x53   : > { %375 = vst [vmem:[%s2763_s11 + $0x2f8] sm:$0xff] %v374_v31  ;;  %377 = vst [vmem:[%s2763_s11 + $0x300] sm:$0xff] %v376_v32  ;;  %v384_v36 = vld [vmem:[%s2755_s10 + $0x960] sm:$0xff]  ;;  %v386_v37 = vld [vmem:[%s2755_s10 + $0x968] sm:$0xff] }
  0x54   : > { %379 = vst [vmem:[%s2763_s11 + $0x308] sm:$0xff] %v378_v33  ;;  %381 = vst [vmem:[%s2763_s11 + $0x310] sm:$0xff] %v380_v34  ;;  %v388_v38 = vld [vmem:[%s2755_s10 + $0x970] sm:$0xff]  ;;  %v390_v39 = vld [vmem:[%s2755_s10 + $0x978] sm:$0xff] }
  0x55   : > { %383 = vst [vmem:[%s2763_s11 + $0x318] sm:$0xff] %v382_v35  ;;  %385 = vst [vmem:[%s2763_s11 + $0x320] sm:$0xff] %v384_v36  ;;  %v392_v40 = vld [vmem:[%s2755_s10 + $0x9c0] sm:$0xff]  ;;  %v394_v41 = vld [vmem:[%s2755_s10 + $0x9c8] sm:$0xff] }
  0x56   : > { %387 = vst [vmem:[%s2763_s11 + $0x328] sm:$0xff] %v386_v37  ;;  %389 = vst [vmem:[%s2763_s11 + $0x330] sm:$0xff] %v388_v38  ;;  %v396_v42 = vld [vmem:[%s2755_s10 + $0x9d0] sm:$0xff]  ;;  %v398_v43 = vld [vmem:[%s2755_s10 + $0x9d8] sm:$0xff] }
  0x57   : > { %391 = vst [vmem:[%s2763_s11 + $0x338] sm:$0xff] %v390_v39  ;;  %393 = vst [vmem:[%s2763_s11 + $0x340] sm:$0xff] %v392_v40  ;;  %v400_v44 = vld [vmem:[%s2755_s10 + $0xa20] sm:$0xff]  ;;  %v402_v45 = vld [vmem:[%s2755_s10 + $0xa28] sm:$0xff] }
  0x58   : > { %395 = vst [vmem:[%s2763_s11 + $0x348] sm:$0xff] %v394_v41  ;;  %397 = vst [vmem:[%s2763_s11 + $0x350] sm:$0xff] %v396_v42  ;;  %v404_v46 = vld [vmem:[%s2755_s10 + $0xa30] sm:$0xff]  ;;  %v406_v47 = vld [vmem:[%s2755_s10 + $0xa38] sm:$0xff] }
  0x59   : > { %399 = vst [vmem:[%s2763_s11 + $0x358] sm:$0xff] %v398_v43  ;;  %401 = vst [vmem:[%s2763_s11 + $0x360] sm:$0xff] %v400_v44  ;;  %v408_v48 = vld [vmem:[%s2755_s10 + $0xa80] sm:$0xff]  ;;  %v410_v49 = vld [vmem:[%s2755_s10 + $0xa88] sm:$0xff] }
  0x5a   : > { %403 = vst [vmem:[%s2763_s11 + $0x368] sm:$0xff] %v402_v45  ;;  %405 = vst [vmem:[%s2763_s11 + $0x370] sm:$0xff] %v404_v46  ;;  %v412_v50 = vld [vmem:[%s2755_s10 + $0xa90] sm:$0xff]  ;;  %v414_v51 = vld [vmem:[%s2755_s10 + $0xa98] sm:$0xff] }
  0x5b   : > { %407 = vst [vmem:[%s2763_s11 + $0x378] sm:$0xff] %v406_v47  ;;  %409 = vst [vmem:[%s2763_s11 + $0x380] sm:$0xff] %v408_v48  ;;  %v416_v52 = vld [vmem:[%s2755_s10 + $0xae0] sm:$0xff]  ;;  %v418_v53 = vld [vmem:[%s2755_s10 + $0xae8] sm:$0xff] }
  0x5c   : > { %411 = vst [vmem:[%s2763_s11 + $0x388] sm:$0xff] %v410_v49  ;;  %413 = vst [vmem:[%s2763_s11 + $0x390] sm:$0xff] %v412_v50  ;;  %v420_v54 = vld [vmem:[%s2755_s10 + $0xaf0] sm:$0xff]  ;;  %v422_v55 = vld [vmem:[%s2755_s10 + $0xaf8] sm:$0xff] }
  0x5d   : > { %415 = vst [vmem:[%s2763_s11 + $0x398] sm:$0xff] %v414_v51  ;;  %417 = vst [vmem:[%s2763_s11 + $0x3a0] sm:$0xff] %v416_v52  ;;  %v424_v56 = vld [vmem:[%s2755_s10 + $0xb40] sm:$0xff]  ;;  %v426_v57 = vld [vmem:[%s2755_s10 + $0xb48] sm:$0xff] }
  0x5e   : > { %419 = vst [vmem:[%s2763_s11 + $0x3a8] sm:$0xff] %v418_v53  ;;  %421 = vst [vmem:[%s2763_s11 + $0x3b0] sm:$0xff] %v420_v54  ;;  %v428_v58 = vld [vmem:[%s2755_s10 + $0xb50] sm:$0xff]  ;;  %v430_v59 = vld [vmem:[%s2755_s10 + $0xb58] sm:$0xff] }
  0x5f   : > { %423 = vst [vmem:[%s2763_s11 + $0x3b8] sm:$0xff] %v422_v55  ;;  %425 = vst [vmem:[%s2763_s11 + $0x3c0] sm:$0xff] %v424_v56  ;;  %v432_v60 = vld [vmem:[%s2755_s10 + $0xba0] sm:$0xff]  ;;  %v434_v61 = vld [vmem:[%s2755_s10 + $0xba8] sm:$0xff] }
  0x60   : > { %427 = vst [vmem:[%s2763_s11 + $0x3c8] sm:$0xff] %v426_v57  ;;  %429 = vst [vmem:[%s2763_s11 + $0x3d0] sm:$0xff] %v428_v58  ;;  %v436_v62 = vld [vmem:[%s2755_s10 + $0xbb0] sm:$0xff]  ;;  %v438_v63 = vld [vmem:[%s2755_s10 + $0xbb8] sm:$0xff] }
  0x61   : > { %431 = vst [vmem:[%s2763_s11 + $0x3d8] sm:$0xff] %v430_v59  ;;  %433 = vst [vmem:[%s2763_s11 + $0x3e0] sm:$0xff] %v432_v60  ;;  %v440_v0 = vld [vmem:[%s2755_s10 + $0xc00] sm:$0xff]  ;;  %v442_v1 = vld [vmem:[%s2755_s10 + $0xc08] sm:$0xff] }
  0x62   : > { %435 = vst [vmem:[%s2763_s11 + $0x3e8] sm:$0xff] %v434_v61  ;;  %437 = vst [vmem:[%s2763_s11 + $0x3f0] sm:$0xff] %v436_v62  ;;  %v444_v2 = vld [vmem:[%s2755_s10 + $0xc10] sm:$0xff]  ;;  %v446_v3 = vld [vmem:[%s2755_s10 + $0xc18] sm:$0xff] }
  0x63   : > { %439 = vst [vmem:[%s2763_s11 + $0x3f8] sm:$0xff] %v438_v63  ;;  %441 = vst [vmem:[%s2763_s11 + $0x400] sm:$0xff] %v440_v0  ;;  %v448_v4 = vld [vmem:[%s2755_s10 + $0xc60] sm:$0xff]  ;;  %v450_v5 = vld [vmem:[%s2755_s10 + $0xc68] sm:$0xff] }
  0x64   : > { %443 = vst [vmem:[%s2763_s11 + $0x408] sm:$0xff] %v442_v1  ;;  %445 = vst [vmem:[%s2763_s11 + $0x410] sm:$0xff] %v444_v2  ;;  %v452_v6 = vld [vmem:[%s2755_s10 + $0xc70] sm:$0xff]  ;;  %v454_v7 = vld [vmem:[%s2755_s10 + $0xc78] sm:$0xff] }
  0x65   : > { %447 = vst [vmem:[%s2763_s11 + $0x418] sm:$0xff] %v446_v3  ;;  %449 = vst [vmem:[%s2763_s11 + $0x420] sm:$0xff] %v448_v4  ;;  %v456_v8 = vld [vmem:[%s2755_s10 + $0xcc0] sm:$0xff]  ;;  %v458_v9 = vld [vmem:[%s2755_s10 + $0xcc8] sm:$0xff] }
  0x66   : > { %451 = vst [vmem:[%s2763_s11 + $0x428] sm:$0xff] %v450_v5  ;;  %453 = vst [vmem:[%s2763_s11 + $0x430] sm:$0xff] %v452_v6  ;;  %v460_v10 = vld [vmem:[%s2755_s10 + $0xcd0] sm:$0xff]  ;;  %v462_v11 = vld [vmem:[%s2755_s10 + $0xcd8] sm:$0xff] }
  0x67   : > { %455 = vst [vmem:[%s2763_s11 + $0x438] sm:$0xff] %v454_v7  ;;  %457 = vst [vmem:[%s2763_s11 + $0x440] sm:$0xff] %v456_v8  ;;  %v464_v12 = vld [vmem:[%s2755_s10 + $0xd20] sm:$0xff]  ;;  %v466_v13 = vld [vmem:[%s2755_s10 + $0xd28] sm:$0xff] }
  0x68   : > { %459 = vst [vmem:[%s2763_s11 + $0x448] sm:$0xff] %v458_v9  ;;  %461 = vst [vmem:[%s2763_s11 + $0x450] sm:$0xff] %v460_v10  ;;  %v468_v14 = vld [vmem:[%s2755_s10 + $0xd30] sm:$0xff]  ;;  %v470_v15 = vld [vmem:[%s2755_s10 + $0xd38] sm:$0xff] }
  0x69   : > { %463 = vst [vmem:[%s2763_s11 + $0x458] sm:$0xff] %v462_v11  ;;  %465 = vst [vmem:[%s2763_s11 + $0x460] sm:$0xff] %v464_v12  ;;  %v472_v16 = vld [vmem:[%s2755_s10 + $0xd80] sm:$0xff]  ;;  %v474_v17 = vld [vmem:[%s2755_s10 + $0xd88] sm:$0xff] }
  0x6a   : > { %467 = vst [vmem:[%s2763_s11 + $0x468] sm:$0xff] %v466_v13  ;;  %469 = vst [vmem:[%s2763_s11 + $0x470] sm:$0xff] %v468_v14  ;;  %v476_v18 = vld [vmem:[%s2755_s10 + $0xd90] sm:$0xff]  ;;  %v478_v19 = vld [vmem:[%s2755_s10 + $0xd98] sm:$0xff] }
  0x6b   : > { %471 = vst [vmem:[%s2763_s11 + $0x478] sm:$0xff] %v470_v15  ;;  %473 = vst [vmem:[%s2763_s11 + $0x480] sm:$0xff] %v472_v16  ;;  %v480_v20 = vld [vmem:[%s2755_s10 + $0xde0] sm:$0xff]  ;;  %v482_v21 = vld [vmem:[%s2755_s10 + $0xde8] sm:$0xff] }
  0x6c   : > { %475 = vst [vmem:[%s2763_s11 + $0x488] sm:$0xff] %v474_v17  ;;  %477 = vst [vmem:[%s2763_s11 + $0x490] sm:$0xff] %v476_v18  ;;  %v484_v22 = vld [vmem:[%s2755_s10 + $0xdf0] sm:$0xff]  ;;  %v486_v23 = vld [vmem:[%s2755_s10 + $0xdf8] sm:$0xff] }
  0x6d   : > { %479 = vst [vmem:[%s2763_s11 + $0x498] sm:$0xff] %v478_v19  ;;  %481 = vst [vmem:[%s2763_s11 + $0x4a0] sm:$0xff] %v480_v20  ;;  %v488_v24 = vld [vmem:[%s2755_s10 + $0xe40] sm:$0xff]  ;;  %v490_v25 = vld [vmem:[%s2755_s10 + $0xe48] sm:$0xff] }
  0x6e   : > { %483 = vst [vmem:[%s2763_s11 + $0x4a8] sm:$0xff] %v482_v21  ;;  %485 = vst [vmem:[%s2763_s11 + $0x4b0] sm:$0xff] %v484_v22  ;;  %v492_v26 = vld [vmem:[%s2755_s10 + $0xe50] sm:$0xff]  ;;  %v494_v27 = vld [vmem:[%s2755_s10 + $0xe58] sm:$0xff] }
  0x6f   : > { %487 = vst [vmem:[%s2763_s11 + $0x4b8] sm:$0xff] %v486_v23  ;;  %489 = vst [vmem:[%s2763_s11 + $0x4c0] sm:$0xff] %v488_v24  ;;  %v496_v28 = vld [vmem:[%s2755_s10 + $0xea0] sm:$0xff]  ;;  %v498_v29 = vld [vmem:[%s2755_s10 + $0xea8] sm:$0xff] }
  0x70   : > { %491 = vst [vmem:[%s2763_s11 + $0x4c8] sm:$0xff] %v490_v25  ;;  %493 = vst [vmem:[%s2763_s11 + $0x4d0] sm:$0xff] %v492_v26  ;;  %v500_v30 = vld [vmem:[%s2755_s10 + $0xeb0] sm:$0xff]  ;;  %v502_v31 = vld [vmem:[%s2755_s10 + $0xeb8] sm:$0xff] }
  0x71   : > { %495 = vst [vmem:[%s2763_s11 + $0x4d8] sm:$0xff] %v494_v27  ;;  %497 = vst [vmem:[%s2763_s11 + $0x4e0] sm:$0xff] %v496_v28 }
  0x72   : > { %499 = vst [vmem:[%s2763_s11 + $0x4e8] sm:$0xff] %v498_v29  ;;  %501 = vst [vmem:[%s2763_s11 + $0x4f0] sm:$0xff] %v500_v30 }
  0x73   : > { %503 = vst [vmem:[%s2763_s11 + $0x4f8] sm:$0xff] %v502_v31 }
  0x74 PF: > { %512 = sbr.rel (%p2736_p7) target bundleno = 549 (0x225), region = 55 }
  0x79   : > { %2655 = dma.done.wait (%p2732_p6), [#allocation3], 16  }
  0x7a   : > { %2657 = vsyncadd (%p2732_p6), [#allocation3], 4294967280  ;;  %s519_s12 = sand.u32 1, %s2660_s15  }
  0x7b   : > { %s2575_s13 = smul.u32 1280, %s519_s12 }
  0x7d   : > { %s3086_s14 = scalar_lea.vmem [#allocation4], %s2575_s13 }
  0x7e   : > { %525 = sfence }
  0x7f   : > { %v583_v32 = vld [vmem:[%s3086_s14 + $0x3e0] sm:$0xff]  ;;  %v3116_v57 = vld [vmem:[%s3646_s2 + $0x10] sm:$0xff]  ;;  %vm617_vm0 = vcmask 523264   ;;  %v2055_v58 = vld [vmem:[%s3086_s14 + $0x3e8] sm:$0xff]  ;;  %s2015_s24 = sld [smem:[#allocation2 + $0x1]]  ;;  %s2014_s25 = sshll.u32 %s2005_s18, 2 }
  0x80   : > { %v591_v33 = vld [vmem:[%s3086_s14 + $0x4e0] sm:$0xff]  ;;  %2174 = vmatprep.subr.mxu0 %v583_v32  ;;  %v3123_v60 = vld [vmem:[%s3646_s2 + $0x28] sm:$0xff]  ;;  %2478 = vmatprep.mubr.msk.f32.mxu1 %vm617_vm0, %v3116_v57  ;;  %p546_p4 = scmp.lt.s32.totalorder %s2014_s25, 11 }
  0x81   : > { %v567_v34 = vld [vmem:[%s3086_s14 + $0x1e0] sm:$0xff]  ;;  %2462 = vmatprep.subr.mxu1 %v591_v33  ;;  %v2039_v62 = vld [vmem:[%s3086_s14 + $0x1e8] sm:$0xff] }
  0x82   : > { %v582_v35 = vld [vmem:[%s3086_s14 + $0x3c0] sm:$0xff]  ;;  %2175 = vmatpush3.msra.mxu0 %v567_v34  ;;  %2463 = vmatpush3.msra.mxu1 %v591_v33  ;;  %v2054_v0 = vld [vmem:[%s3086_s14 + $0x3c8] sm:$0xff]  ;;  %s3658_s25 = smov (!%p546_p4, %s2014_s25), 11 }
  0x83   : > { %v590_v36 = vld [vmem:[%s3086_s14 + $0x4c0] sm:$0xff]  ;;  %2176 = vmatprep.subr.mxu0 %v582_v35  ;;  %v2038_v2 = vld [vmem:[%s3086_s14 + $0x1c8] sm:$0xff]  ;;  %v3188_v35 = vld [vmem:[%s3646_s2 + $0x18] sm:$0xff]  ;;  %s3593_s26 = scalar_lea.vmem %s3648_s4, %s3658_s25 }
  0x84   : > { %v566_v37 = vld [vmem:[%s3086_s14 + $0x1c0] sm:$0xff]  ;;  %2464 = vmatprep.subr.mxu1 %v590_v36  ;;  %v2053_v4 = vld [vmem:[%s3086_s14 + $0x3a8] sm:$0xff] }
  0x85   : > { %v581_v38 = vld [vmem:[%s3086_s14 + $0x3a0] sm:$0xff]  ;;  %2177 = vmatpush3.msra.mxu0 %v566_v37  ;;  %2465 = vmatpush3.msra.mxu1 %v590_v36  ;;  %v2037_v6 = vld [vmem:[%s3086_s14 + $0x1a8] sm:$0xff]  ;;  %v3193_v36 = vld [vmem:[%s3646_s2 + $0x58] sm:$0xff] }
  0x86   : > { %v589_v39 = vld [vmem:[%s3086_s14 + $0x4a0] sm:$0xff]  ;;  %2178 = vmatprep.subr.mxu0 %v581_v38  ;;  %v2052_v8 = vld [vmem:[%s3086_s14 + $0x388] sm:$0xff] }
  0x87   : > { %v565_v40 = vld [vmem:[%s3086_s14 + $0x1a0] sm:$0xff]  ;;  %2466 = vmatprep.subr.mxu1 %v589_v39  ;;  %v2036_v10 = vld [vmem:[%s3086_s14 + $0x188] sm:$0xff] }
  0x88   : > { %v580_v41 = vld [vmem:[%s3086_s14 + $0x380] sm:$0xff]  ;;  %2179 = vmatpush3.msra.mxu0 %v565_v40  ;;  %2467 = vmatpush3.msra.mxu1 %v589_v39  ;;  %v2051_v12 = vld [vmem:[%s3086_s14 + $0x368] sm:$0xff] }
  0x89   : > { %v588_v42 = vld [vmem:[%s3086_s14 + $0x480] sm:$0xff]  ;;  %2180 = vmatprep.subr.mxu0 %v580_v41  ;;  %v2035_v14 = vld [vmem:[%s3086_s14 + $0x168] sm:$0xff]  ;;  %v3208_v41 = vld [vmem:[%s3646_s2 + $0x38] sm:$0xff] }
  0x8a   : > { %v564_v43 = vld [vmem:[%s3086_s14 + $0x180] sm:$0xff]  ;;  %2468 = vmatprep.subr.mxu1 %v588_v42  ;;  %v2050_v16 = vld [vmem:[%s3086_s14 + $0x348] sm:$0xff] }
  0x8b   : > { %v579_v44 = vld [vmem:[%s3086_s14 + $0x360] sm:$0xff]  ;;  %2181 = vmatpush3.msra.mxu0 %v564_v43  ;;  %2469 = vmatpush3.msra.mxu1 %v588_v42  ;;  %v2034_v18 = vld [vmem:[%s3086_s14 + $0x148] sm:$0xff]  ;;  %v3213_v42 = vld [vmem:[%s3646_s2 + $0x70] sm:$0xff] }
  0x8c   : > { %v587_v45 = vld [vmem:[%s3086_s14 + $0x460] sm:$0xff]  ;;  %2182 = vmatprep.subr.mxu0 %v579_v44  ;;  %v2049_v20 = vld [vmem:[%s3086_s14 + $0x328] sm:$0xff]  ;;  %v3219_v44 = vld [vmem:[%s3646_s2 + $0x30] sm:$0xff] }
  0x8d   : > { %v563_v46 = vld [vmem:[%s3086_s14 + $0x160] sm:$0xff]  ;;  %2470 = vmatprep.subr.mxu1 %v587_v45  ;;  %v2033_v22 = vld [vmem:[%s3086_s14 + $0x128] sm:$0xff] }
  0x8e   : > { %v578_v47 = vld [vmem:[%s3086_s14 + $0x340] sm:$0xff]  ;;  %2183 = vmatpush3.msra.mxu0 %v563_v46  ;;  %2471 = vmatpush3.msra.mxu1 %v587_v45  ;;  %v2048_v24 = vld [vmem:[%s3086_s14 + $0x308] sm:$0xff] }
  0x8f   : > { %v586_v48 = vld [vmem:[%s3086_s14 + $0x440] sm:$0xff]  ;;  %2184 = vmatprep.subr.mxu0 %v578_v47  ;;  %v3160_v25 = vld [vmem:[%s3646_s2 + $0x8] sm:$0xff] }
  0x90   : > { %v562_v49 = vld [vmem:[%s3086_s14 + $0x140] sm:$0xff]  ;;  %2472 = vmatprep.subr.mxu1 %v586_v48  ;;  %v2032_v26 = vld [vmem:[%s3086_s14 + $0x108] sm:$0xff]  ;;  %706 = vmatprep.mubr.f32.mxu0 %v3160_v25 }
  0x91   : > { %v577_v50 = vld [vmem:[%s3086_s14 + $0x320] sm:$0xff]  ;;  %2185 = vmatpush3.msra.mxu0 %v562_v49  ;;  %2473 = vmatpush3.msra.mxu1 %v586_v48  ;;  %v2047_v28 = vld [vmem:[%s3086_s14 + $0x2e8] sm:$0xff] }
  0x92   : > { %v585_v51 = vld [vmem:[%s3086_s14 + $0x420] sm:$0xff]  ;;  %2186 = vmatprep.subr.mxu0 %v577_v50  ;;  %v2063_v29 = vld [vmem:[%s3086_s14 + $0x4e8] sm:$0xff]  ;;  %v3239_v50 = vld [vmem:[%s3646_s2 + $0x50] sm:$0xff] }
  0x93   : > { %v561_v52 = vld [vmem:[%s3086_s14 + $0x120] sm:$0xff]  ;;  %2474 = vmatprep.subr.mxu1 %v585_v51  ;;  %v2031_v30 = vld [vmem:[%s3086_s14 + $0xe8] sm:$0xff] }
  0x94   : > { %v576_v53 = vld [vmem:[%s3086_s14 + $0x300] sm:$0xff]  ;;  %2187 = vmatpush3.msra.mxu0 %v561_v52  ;;  %2475 = vmatpush3.msra.mxu1 %v585_v51  ;;  %v2046_v31 = vld [vmem:[%s3086_s14 + $0x2c8] sm:$0xff] }
  0x95   : > { %v584_v54 = vld [vmem:[%s3086_s14 + $0x400] sm:$0xff]  ;;  %2188 = vmatprep.subr.mxu0 %v576_v53  ;;  %v2030_v34 = vld [vmem:[%s3086_s14 + $0xc8] sm:$0xff] }
  0x96   : > { %v560_v55 = vld [vmem:[%s3086_s14 + $0x100] sm:$0xff]  ;;  %2476 = vmatprep.subr.mxu1 %v584_v54  ;;  %v2045_v37 = vld [vmem:[%s3086_s14 + $0x2a8] sm:$0xff] }
  0x97   : > { %v575_v56 = vld [vmem:[%s3086_s14 + $0x2e0] sm:$0xff]  ;;  %2189 = vmatpush3.msra.mxu0 %v560_v55  ;;  %2477 = vmatpush3.msra.mxu1 %v584_v54  ;;  %v2062_v38 = vld [vmem:[%s3086_s14 + $0x4c8] sm:$0xff]  ;;  %v3255_v54 = vld [vmem:[%s3646_s2 + $0xb8] sm:$0xff] }
  0x98   : > { %v559_v59 = vld [vmem:[%s3086_s14 + $0xe0] sm:$0xff]  ;;  %2190 = vmatprep.subr.mxu0 %v575_v56  ;;  %2246 = vmatprep.subr.mxu1 %v2055_v58  ;;  %v2029_v39 = vld [vmem:[%s3086_s14 + $0xa8] sm:$0xff] }
  0x99   : > { %v574_v61 = vld [vmem:[%s3086_s14 + $0x2c0] sm:$0xff]  ;;  %2191 = vmatpush3.msra.mxu0 %v559_v59  ;;  %2479 = vmatmul.mubr.msk.f32.vlgmr.msra.gmra.mxu1 %vm617_vm0, %v3123_v60  ;;  %v2044_v40 = vld [vmem:[%s3086_s14 + $0x288] sm:$0xff] }
  0x9a   : > { %v558_v63 = vld [vmem:[%s3086_s14 + $0xc0] sm:$0xff]  ;;  %2192 = vmatprep.subr.mxu0 %v574_v61  ;;  %2247 = vmatpush3.msra.mxu1 %v2039_v62  ;;  %v2028_v43 = vld [vmem:[%s3086_s14 + $0x88] sm:$0xff] }
  0x9b   : > { %v573_v1 = vld [vmem:[%s3086_s14 + $0x2a0] sm:$0xff]  ;;  %2193 = vmatpush3.msra.mxu0 %v558_v63  ;;  %2248 = vmatprep.subr.mxu1 %v2054_v0  ;;  %v3224_v45 = vld [vmem:[%s3646_s2 + $0x88] sm:$0xff] }
  0x9c   : > { %v557_v3 = vld [vmem:[%s3086_s14 + $0xa0] sm:$0xff]  ;;  %2194 = vmatprep.subr.mxu0 %v573_v1  ;;  %2249 = vmatpush3.msra.mxu1 %v2038_v2  ;;  %v2043_v46 = vld [vmem:[%s3086_s14 + $0x268] sm:$0xff]  ;;  %v2104_v1 = vld [vmem:[%s3086_s14 + $0x3f0] sm:$0xff] }
  0x9d   : > { %v572_v5 = vld [vmem:[%s3086_s14 + $0x280] sm:$0xff]  ;;  %2195 = vmatpush3.msra.mxu0 %v557_v3  ;;  %2250 = vmatprep.subr.mxu1 %v2053_v4  ;;  %v2061_v47 = vld [vmem:[%s3086_s14 + $0x4a8] sm:$0xff]  ;;  %v2088_v2 = vld [vmem:[%s3086_s14 + $0x1f0] sm:$0xff] }
  0x9e   : > { %v556_v7 = vld [vmem:[%s3086_s14 + $0x80] sm:$0xff]  ;;  %2196 = vmatprep.subr.mxu0 %v572_v5  ;;  %2251 = vmatpush3.msra.mxu1 %v2037_v6  ;;  %v2027_v48 = vld [vmem:[%s3086_s14 + $0x68] sm:$0xff]  ;;  %v2103_v3 = vld [vmem:[%s3086_s14 + $0x3d0] sm:$0xff] }
  0x9f   : > { %v571_v9 = vld [vmem:[%s3086_s14 + $0x260] sm:$0xff]  ;;  %2197 = vmatpush3.msra.mxu0 %v556_v7  ;;  %2252 = vmatprep.subr.mxu1 %v2052_v8  ;;  %v2042_v49 = vld [vmem:[%s3086_s14 + $0x248] sm:$0xff]  ;;  %v2087_v5 = vld [vmem:[%s3086_s14 + $0x1d0] sm:$0xff] }
  0xa0   : > { %v555_v11 = vld [vmem:[%s3086_s14 + $0x60] sm:$0xff]  ;;  %2198 = vmatprep.subr.mxu0 %v571_v9  ;;  %2253 = vmatpush3.msra.mxu1 %v2036_v10  ;;  %v2026_v52 = vld [vmem:[%s3086_s14 + $0x48] sm:$0xff]  ;;  %v3295_v6 = vld [vmem:[%s3646_s2 + $0x78] sm:$0xff] }
  0xa1   : > { %v570_v13 = vld [vmem:[%s3086_s14 + $0x240] sm:$0xff]  ;;  %2199 = vmatpush3.msra.mxu0 %v555_v11  ;;  %2254 = vmatprep.subr.mxu1 %v2051_v12  ;;  %v3250_v53 = vld [vmem:[%s3646_s2 + $0x48] sm:$0xff]  ;;  %v2102_v8 = vld [vmem:[%s3086_s14 + $0x3b0] sm:$0xff] }
  0xa2   : > { %v554_v15 = vld [vmem:[%s3086_s14 + $0x40] sm:$0xff]  ;;  %2200 = vmatprep.subr.mxu0 %v570_v13  ;;  %2255 = vmatpush3.msra.mxu1 %v2035_v14  ;;  %v2041_v55 = vld [vmem:[%s3086_s14 + $0x228] sm:$0xff]  ;;  %v2086_v9 = vld [vmem:[%s3086_s14 + $0x1b0] sm:$0xff] }
  0xa3   : > { %v569_v17 = vld [vmem:[%s3086_s14 + $0x220] sm:$0xff]  ;;  %2201 = vmatpush3.msra.mxu0 %v554_v15  ;;  %2256 = vmatprep.subr.mxu1 %v2050_v16  ;;  %v2060_v56 = vld [vmem:[%s3086_s14 + $0x488] sm:$0xff]  ;;  %v2101_v10 = vld [vmem:[%s3086_s14 + $0x390] sm:$0xff] }
  0xa4   : > { %v553_v19 = vld [vmem:[%s3086_s14 + $0x20] sm:$0xff]  ;;  %2202 = vmatprep.subr.mxu0 %v569_v17  ;;  %2257 = vmatpush3.msra.mxu1 %v2034_v18  ;;  %v2025_v58 = vld [vmem:[%s3086_s14 + $0x28] sm:$0xff]  ;;  %v3308_v11 = vld [vmem:[%s3646_s2 + $0x98] sm:$0xff] }
  0xa5   : > { %v568_v21 = vld [vmem:[%s3086_s14 + $0x200] sm:$0xff]  ;;  %2203 = vmatpush3.msra.mxu0 %v553_v19  ;;  %2258 = vmatprep.subr.mxu1 %v2049_v20  ;;  %v2040_v59 = vld [vmem:[%s3086_s14 + $0x208] sm:$0xff]  ;;  %v2085_v12 = vld [vmem:[%s3086_s14 + $0x190] sm:$0xff] }
  0xa6   : > { %v552_v23 = vld [vmem:[%s3086_s14] sm:$0xff]  ;;  %2204 = vmatprep.subr.mxu0 %v568_v21  ;;  %2259 = vmatpush3.msra.mxu1 %v2033_v22  ;;  %v3270_v61 = vld [vmem:[%s3646_s2 + $0x68] sm:$0xff]  ;;  %v3314_v13 = vld [vmem:[%s3646_s2 + $0x90] sm:$0xff] }
  0xa7   : > { %v3166_v27 = vld [vmem:[%s3646_s2] sm:$0xff]  ;;  %2205 = vmatpush3.msra.mxu0 %v552_v23  ;;  %2260 = vmatprep.subr.mxu1 %v2048_v24  ;;  %v2024_v62 = vld [vmem:[%s3086_s14 + $0x8] sm:$0xff]  ;;  %v2100_v15 = vld [vmem:[%s3086_s14 + $0x370] sm:$0xff] }
  0xa8   : > { %2261 = vmatpush3.msra.mxu1 %v2032_v26  ;;  %707 = vmatmul.mubr.f32.vlgmr.msra.gmra.mxu0 %v3166_v27  ;;  %v3177_v32 = vld [vmem:[%s3646_s2 + $0x20] sm:$0xff]  ;;  %v2059_v0 = vld [vmem:[%s3086_s14 + $0x468] sm:$0xff]  ;;  %v2084_v16 = vld [vmem:[%s3086_s14 + $0x170] sm:$0xff] }
  0xa9   : > { %2262 = vmatprep.subr.mxu1 %v2047_v28  ;;  %2490 = vmatprep.subr.mxu0 %v2063_v29  ;;  %v3182_v33 = vld [vmem:[%s3646_s2 + $0x40] sm:$0xff]  ;;  %v2058_v7 = vld [vmem:[%s3086_s14 + $0x448] sm:$0xff]  ;;  %v2099_v17 = vld [vmem:[%s3086_s14 + $0x350] sm:$0xff] }
  0xaa   : > { %2263 = vmatpush3.msra.mxu1 %v2031_v30  ;;  %2491 = vmatpush3.msra.mxu0 %v2063_v29  ;;  %v3244_v51 = vld [vmem:[%s3646_s2 + $0xa0] sm:$0xff]  ;;  %v2057_v14 = vld [vmem:[%s3086_s14 + $0x428] sm:$0xff]  ;;  %v3327_v18 = vld [vmem:[%s3646_s2 + $0xb0] sm:$0xff] }
  0xab   : > { %2264 = vmatprep.subr.mxu1 %v2046_v31  ;;  %711 = vmatprep.mubr.f32.mxu0 %v3177_v32  ;;  %v3276_v63 = vld [vmem:[%s3646_s2 + $0x60] sm:$0xff]  ;;  %v2083_v19 = vld [vmem:[%s3086_s14 + $0x150] sm:$0xff]  ;;  %v3333_v20 = vld [vmem:[%s3646_s2 + $0xa8] sm:$0xff] }
  0xac   : > { %2481 = vmatprep.mubr.msk.f32.mxu1 %vm617_vm0, %v3182_v33  ;;  %2265 = vmatpush3.msra.mxu1 %v2030_v34  ;;  %v3289_v4 = vld [vmem:[%s3646_s2 + $0x80] sm:$0xff]  ;;  %v2056_v21 = vld [vmem:[%s3086_s14 + $0x408] sm:$0xff]  ;;  %v2098_v22 = vld [vmem:[%s3086_s14 + $0x330] sm:$0xff] }
  0xad   : > { %712 = vmatmul.mubr.f32.gmra.mxu0 %v3188_v35  ;;  %2482 = vmatmul.mubr.msk.f32.gmra.mxu1 %vm617_vm0, %v3193_v36  ;;  %v2082_v23 = vld [vmem:[%s3086_s14 + $0x130] sm:$0xff] }
  0xae   : > { %2266 = vmatprep.subr.mxu1 %v2045_v37  ;;  %2492 = vmatprep.subr.mxu0 %v2062_v38  ;;  %v2097_v24 = vld [vmem:[%s3086_s14 + $0x310] sm:$0xff] }
  0xaf   : > { %2267 = vmatpush3.msra.mxu1 %v2029_v39  ;;  %2493 = vmatpush3.msra.mxu0 %v2062_v38  ;;  %v2081_v26 = vld [vmem:[%s3086_s14 + $0x110] sm:$0xff] }
  0xb0   : > { %2268 = vmatprep.subr.mxu1 %v2044_v40  ;;  %716 = vmatprep.mubr.f32.mxu0 %v3208_v41  ;;  %v2112_v28 = vld [vmem:[%s3086_s14 + $0x4f0] sm:$0xff] }
  0xb1   : > { %2484 = vmatprep.mubr.msk.f32.mxu1 %vm617_vm0, %v3213_v42  ;;  %2269 = vmatpush3.msra.mxu1 %v2028_v43  ;;  %v2096_v29 = vld [vmem:[%s3086_s14 + $0x2f0] sm:$0xff] }
  0xb2   : > { %717 = vmatmul.mubr.f32.gmra.mxu0 %v3219_v44  ;;  %2485 = vmatmul.mubr.msk.f32.gmra.mxu1 %vm617_vm0, %v3224_v45  ;;  %v2080_v30 = vld [vmem:[%s3086_s14 + $0xf0] sm:$0xff] }
  0xb3   : > { %2270 = vmatprep.subr.mxu1 %v2043_v46  ;;  %2494 = vmatprep.subr.mxu0 %v2061_v47  ;;  %v2111_v31 = vld [vmem:[%s3086_s14 + $0x4d0] sm:$0xff] }
  0xb4   : > { %2271 = vmatpush3.msra.mxu1 %v2027_v48  ;;  %2495 = vmatpush3.msra.mxu0 %v2061_v47  ;;  %v2095_v34 = vld [vmem:[%s3086_s14 + $0x2d0] sm:$0xff] }
  0xb5   : > { %2272 = vmatprep.subr.mxu1 %v2042_v49  ;;  %721 = vmatprep.mubr.f32.mxu0 %v3239_v50  ;;  %v2079_v37 = vld [vmem:[%s3086_s14 + $0xd0] sm:$0xff] }
  0xb6   : > { %2487 = vmatprep.mubr.msk.f32.mxu1 %vm617_vm0, %v3244_v51  ;;  %2273 = vmatpush3.msra.mxu1 %v2026_v52  ;;  %v2110_v38 = vld [vmem:[%s3086_s14 + $0x4b0] sm:$0xff] }
  0xb7   : > { %722 = vmatmul.mubr.f32.gmra.mxu0 %v3250_v53  ;;  %2488 = vmatmul.mubr.msk.f32.gmra.mxu1 %vm617_vm0, %v3255_v54  ;;  %v2094_v39 = vld [vmem:[%s3086_s14 + $0x2b0] sm:$0xff] }
  0xb8   : > { %2274 = vmatprep.subr.mxu1 %v2041_v55  ;;  %2496 = vmatprep.subr.mxu0 %v2060_v56  ;;  %v2078_v40 = vld [vmem:[%s3086_s14 + $0xb0] sm:$0xff] }
  0xb9   : > { %2275 = vmatpush3.msra.mxu1 %v2025_v58  ;;  %2497 = vmatpush3.msra.mxu0 %v2060_v56  ;;  %v2109_v43 = vld [vmem:[%s3086_s14 + $0x490] sm:$0xff] }
  0xba   : > { %2276 = vmatprep.subr.mxu1 %v2040_v59  ;;  %726 = vmatprep.mubr.f32.mxu0 %v3270_v61  ;;  %v2093_v46 = vld [vmem:[%s3086_s14 + $0x290] sm:$0xff] }
  0xbb   : > { %2277 = vmatpush3.msra.mxu1 %v2024_v62  ;;  %1055 = vmatprep.mubr.f32.mxu1 %v3160_v25  ;;  %v2077_v47 = vld [vmem:[%s3086_s14 + $0x90] sm:$0xff] }
  0xbc   : > { %727 = vmatmul.mubr.f32.gmra.mxu0 %v3276_v63  ;;  %1056 = vmatmul.mubr.f32.vlgmr.msra.gmra.mxu1 %v3166_v27  ;;  %v2108_v48 = vld [vmem:[%s3086_s14 + $0x470] sm:$0xff] }
  0xbd   : > { %2498 = vmatprep.subr.mxu0 %v2059_v0  ;;  %2318 = vmatprep.subr.mxu1 %v2104_v1  ;;  %v2092_v49 = vld [vmem:[%s3086_s14 + $0x270] sm:$0xff] }
  0xbe   : > { %2499 = vmatpush3.msra.mxu0 %v2059_v0  ;;  %2319 = vmatpush3.msra.mxu1 %v2088_v2  ;;  %v2076_v52 = vld [vmem:[%s3086_s14 + $0x70] sm:$0xff] }
  0xbf   : > { %2320 = vmatprep.subr.mxu1 %v2103_v3  ;;  %731 = vmatprep.mubr.f32.mxu0 %v3289_v4  ;;  %v2107_v55 = vld [vmem:[%s3086_s14 + $0x450] sm:$0xff] }
  0xc0   : > { %1060 = vmatprep.mubr.f32.mxu1 %v3177_v32  ;;  %2321 = vmatpush3.msra.mxu1 %v2087_v5  ;;  %v2091_v56 = vld [vmem:[%s3086_s14 + $0x250] sm:$0xff]  ;;  %v2153_v5 = vld [vmem:[%s3086_s14 + $0x3f8] sm:$0xff] }
  0xc1   : > { %732 = vmatmul.mubr.f32.gmra.mxu0 %v3295_v6  ;;  %1061 = vmatmul.mubr.f32.gmra.mxu1 %v3188_v35  ;;  %v2075_v58 = vld [vmem:[%s3086_s14 + $0x50] sm:$0xff] }
  0xc2   : > { %2500 = vmatprep.subr.mxu0 %v2058_v7  ;;  %2322 = vmatprep.subr.mxu1 %v2102_v8  ;;  %v2106_v59 = vld [vmem:[%s3086_s14 + $0x430] sm:$0xff]  ;;  %v2152_v8 = vld [vmem:[%s3086_s14 + $0x3d8] sm:$0xff] }
  0xc3   : > { %2501 = vmatpush3.msra.mxu0 %v2058_v7  ;;  %2323 = vmatpush3.msra.mxu1 %v2086_v9  ;;  %v2090_v62 = vld [vmem:[%s3086_s14 + $0x230] sm:$0xff]  ;;  %v2137_v7 = vld [vmem:[%s3086_s14 + $0x1f8] sm:$0xff] }
  0xc4   : > { %2324 = vmatprep.subr.mxu1 %v2101_v10  ;;  %736 = vmatprep.mubr.f32.mxu0 %v3308_v11  ;;  %v2074_v0 = vld [vmem:[%s3086_s14 + $0x30] sm:$0xff]  ;;  %v2161_v9 = vld [vmem:[%s3086_s14 + $0x4f8] sm:$0xff] }
  0xc5   : > { %1065 = vmatprep.mubr.f32.mxu1 %v3208_v41  ;;  %2325 = vmatpush3.msra.mxu1 %v2085_v12  ;;  %v2105_v1 = vld [vmem:[%s3086_s14 + $0x410] sm:$0xff]  ;;  %v2136_v10 = vld [vmem:[%s3086_s14 + $0x1d8] sm:$0xff] }
  0xc6   : > { %737 = vmatmul.mubr.f32.gmra.mxu0 %v3314_v13  ;;  %1066 = vmatmul.mubr.f32.gmra.mxu1 %v3219_v44  ;;  %v2089_v2 = vld [vmem:[%s3086_s14 + $0x210] sm:$0xff]  ;;  %v2151_v12 = vld [vmem:[%s3086_s14 + $0x3b8] sm:$0xff] }
  0xc7   : > { %2502 = vmatprep.subr.mxu0 %v2057_v14  ;;  %2326 = vmatprep.subr.mxu1 %v2100_v15  ;;  %v2073_v3 = vld [vmem:[%s3086_s14 + $0x10] sm:$0xff]  ;;  %v2150_v15 = vld [vmem:[%s3086_s14 + $0x398] sm:$0xff] }
  0xc8   : > { %2503 = vmatpush3.msra.mxu0 %v2057_v14  ;;  %2327 = vmatpush3.msra.mxu1 %v2084_v16  ;;  %v2135_v14 = vld [vmem:[%s3086_s14 + $0x1b8] sm:$0xff] }
  0xc9   : > { %2328 = vmatprep.subr.mxu1 %v2099_v17  ;;  %741 = vmatprep.mubr.f32.mxu0 %v3327_v18  ;;  %v2134_v16 = vld [vmem:[%s3086_s14 + $0x198] sm:$0xff] }
  0xca   : > { %1070 = vmatprep.mubr.f32.mxu1 %v3239_v50  ;;  %2329 = vmatpush3.msra.mxu1 %v2083_v19  ;;  %v2149_v17 = vld [vmem:[%s3086_s14 + $0x378] sm:$0xff] }
  0xcb   : > { %742 = vmatmul.mubr.f32.gmra.mxu0 %v3333_v20  ;;  %1071 = vmatmul.mubr.f32.gmra.mxu1 %v3250_v53  ;;  %v2133_v19 = vld [vmem:[%s3086_s14 + $0x178] sm:$0xff] }
  0xcc   : > { %2504 = vmatprep.subr.mxu0 %v2056_v21  ;;  %2330 = vmatprep.subr.mxu1 %v2098_v22  ;;  %v2132_v22 = vld [vmem:[%s3086_s14 + $0x158] sm:$0xff] }
  0xcd   : > { %2505 = vmatpush3.msra.mxu0 %v2056_v21  ;;  %2331 = vmatpush3.msra.mxu1 %v2082_v23  ;;  %v2148_v21 = vld [vmem:[%s3086_s14 + $0x358] sm:$0xff] }
  0xce   : > { %2332 = vmatprep.subr.mxu1 %v2097_v24  ;;  %1075 = vmatprep.mubr.f32.mxu1 %v3270_v61  ;;  %v2147_v23 = vld [vmem:[%s3086_s14 + $0x338] sm:$0xff] }
  0xcf   : > { %2506 = vmatprep.mubr.msk.f32.mxu0 %vm617_vm0, %v3116_v57  ;;  %2333 = vmatpush3.msra.mxu1 %v2081_v26  ;;  %v2131_v24 = vld [vmem:[%s3086_s14 + $0x138] sm:$0xff] }
  0xd0   : > { %2518 = vmatprep.subr.mxu0 %v2112_v28  ;;  %1076 = vmatmul.mubr.f32.gmra.mxu1 %v3276_v63  ;;  %v2160_v26 = vld [vmem:[%s3086_s14 + $0x4d8] sm:$0xff] }
  0xd1   : > { %2507 = vmatmul.mubr.msk.f32.vlgmr.msra.gmra.mxu0 %vm617_vm0, %v3123_v60  ;;  %2334 = vmatprep.subr.mxu1 %v2096_v29  ;;  %v2130_v29 = vld [vmem:[%s3086_s14 + $0x118] sm:$0xff] }
  0xd2   : > { %2519 = vmatpush3.msra.mxu0 %v2112_v28  ;;  %2335 = vmatpush3.msra.mxu1 %v2080_v30  ;;  %v2146_v28 = vld [vmem:[%s3086_s14 + $0x318] sm:$0xff] }
  0xd3   : > { %2520 = vmatprep.subr.mxu0 %v2111_v31  ;;  %2336 = vmatprep.subr.mxu1 %v2095_v34  ;;  %v2145_v30 = vld [vmem:[%s3086_s14 + $0x2f8] sm:$0xff] }
  0xd4   : > { %2521 = vmatpush3.msra.mxu0 %v2111_v31  ;;  %1080 = vmatprep.mubr.f32.mxu1 %v3289_v4  ;;  %v2129_v31 = vld [vmem:[%s3086_s14 + $0xf8] sm:$0xff] }
  0xd5   : > { %2509 = vmatprep.mubr.msk.f32.mxu0 %vm617_vm0, %v3182_v33  ;;  %2337 = vmatpush3.msra.mxu1 %v2079_v37  ;;  %v2159_v34 = vld [vmem:[%s3086_s14 + $0x4b8] sm:$0xff] }
  0xd6   : > { %2522 = vmatprep.subr.mxu0 %v2110_v38  ;;  %1081 = vmatmul.mubr.f32.gmra.mxu1 %v3295_v6  ;;  %v2144_v37 = vld [vmem:[%s3086_s14 + $0x2d8] sm:$0xff] }
  0xd7   : > { %2510 = vmatmul.mubr.msk.f32.gmra.mxu0 %vm617_vm0, %v3193_v36  ;;  %2338 = vmatprep.subr.mxu1 %v2094_v39  ;;  %v2143_v39 = vld [vmem:[%s3086_s14 + $0x2b8] sm:$0xff] }
  0xd8   : > { %2523 = vmatpush3.msra.mxu0 %v2110_v38  ;;  %2339 = vmatpush3.msra.mxu1 %v2078_v40  ;;  %v2128_v38 = vld [vmem:[%s3086_s14 + $0xd8] sm:$0xff] }
  0xd9   : > { %2524 = vmatprep.subr.mxu0 %v2109_v43  ;;  %2340 = vmatprep.subr.mxu1 %v2093_v46  ;;  %v2127_v40 = vld [vmem:[%s3086_s14 + $0xb8] sm:$0xff] }
  0xda   : > { %2525 = vmatpush3.msra.mxu0 %v2109_v43  ;;  %1085 = vmatprep.mubr.f32.mxu1 %v3308_v11  ;;  %v2142_v43 = vld [vmem:[%s3086_s14 + $0x298] sm:$0xff] }
  0xdb   : > { %2512 = vmatprep.mubr.msk.f32.mxu0 %vm617_vm0, %v3213_v42  ;;  %2341 = vmatpush3.msra.mxu1 %v2077_v47  ;;  %v2158_v46 = vld [vmem:[%s3086_s14 + $0x498] sm:$0xff] }
  0xdc   : > { %2526 = vmatprep.subr.mxu0 %v2108_v48  ;;  %1086 = vmatmul.mubr.f32.gmra.mxu1 %v3314_v13  ;;  %v2126_v47 = vld [vmem:[%s3086_s14 + $0x98] sm:$0xff] }
  0xdd   : > { %2513 = vmatmul.mubr.msk.f32.gmra.mxu0 %vm617_vm0, %v3224_v45  ;;  %2342 = vmatprep.subr.mxu1 %v2092_v49  ;;  %v2125_v49 = vld [vmem:[%s3086_s14 + $0x78] sm:$0xff] }
  0xde   : > { %2527 = vmatpush3.msra.mxu0 %v2108_v48  ;;  %2343 = vmatpush3.msra.mxu1 %v2076_v52  ;;  %v2141_v48 = vld [vmem:[%s3086_s14 + $0x278] sm:$0xff] }
  0xdf   : > { %2528 = vmatprep.subr.mxu0 %v2107_v55  ;;  %2344 = vmatprep.subr.mxu1 %v2091_v56  ;;  %v2140_v52 = vld [vmem:[%s3086_s14 + $0x258] sm:$0xff] }
  0xe0   : > { %2529 = vmatpush3.msra.mxu0 %v2107_v55  ;;  %1090 = vmatprep.mubr.f32.mxu1 %v3327_v18  ;;  %v2124_v55 = vld [vmem:[%s3086_s14 + $0x58] sm:$0xff] }
  0xe1   : > { %2515 = vmatprep.mubr.msk.f32.mxu0 %vm617_vm0, %v3244_v51  ;;  %2345 = vmatpush3.msra.mxu1 %v2075_v58  ;;  %v2157_v56 = vld [vmem:[%s3086_s14 + $0x478] sm:$0xff] }
  0xe2   : > { %2530 = vmatprep.subr.mxu0 %v2106_v59  ;;  %1091 = vmatmul.mubr.f32.gmra.mxu1 %v3333_v20  ;;  %v2139_v58 = vld [vmem:[%s3086_s14 + $0x238] sm:$0xff] }
  0xe3   : > { %2516 = vmatmul.mubr.msk.f32.gmra.mxu0 %vm617_vm0, %v3255_v54  ;;  %2346 = vmatprep.subr.mxu1 %v2090_v62  ;;  %v2138_v62 = vld [vmem:[%s3086_s14 + $0x218] sm:$0xff] }
  0xe4   : > { %2531 = vmatpush3.msra.mxu0 %v2106_v59  ;;  %2347 = vmatpush3.msra.mxu1 %v2074_v0  ;;  %v2123_v59 = vld [vmem:[%s3086_s14 + $0x38] sm:$0xff] }
  0xe5   : > { %2532 = vmatprep.subr.mxu0 %v2105_v1  ;;  %2348 = vmatprep.subr.mxu1 %v2089_v2  ;;  %v2156_v0 = vld [vmem:[%s3086_s14 + $0x458] sm:$0xff] }
  0xe6   : > { %2533 = vmatpush3.msra.mxu0 %v2105_v1  ;;  %2349 = vmatpush3.msra.mxu1 %v2073_v3  ;;  %v2122_v1 = vld [vmem:[%s3086_s14 + $0x18] sm:$0xff] }
  0xe7   : > { %1400 = vmatprep.mubr.f32.mxu1 %v3160_v25  ;;  %2534 = vmatprep.mubr.msk.f32.mxu0 %vm617_vm0, %v3116_v57  ;;  %v2155_v2 = vld [vmem:[%s3086_s14 + $0x438] sm:$0xff] }
  0xe8   : > { %2390 = vmatprep.subr.mxu0 %v2153_v5  ;;  %1401 = vmatmul.mubr.f32.vlgmr.msra.gmra.mxu1 %v3166_v27  ;;  %v2154_v3 = vld [vmem:[%s3086_s14 + $0x418] sm:$0xff]  ;;  %s550_s14 = sld [smem:[#allocation2]] }
  0xe9   : > { %2535 = vmatmul.mubr.msk.f32.vlgmr.msra.gmra.mxu0 %vm617_vm0, %v3123_v60  ;;  %1405 = vmatprep.mubr.f32.mxu1 %v3177_v32 }
  0xea   : > { %2391 = vmatpush3.msra.mxu0 %v2137_v7  ;;  %2537 = vmatprep.mubr.msk.f32.mxu0 %vm617_vm0, %v3182_v33 }
  0xeb   : > { %2392 = vmatprep.subr.mxu0 %v2152_v8  ;;  %2546 = vmatprep.subr.mxu1 %v2161_v9 }
  0xec   : > { %2393 = vmatpush3.msra.mxu0 %v2136_v10  ;;  %1406 = vmatmul.mubr.f32.gmra.mxu1 %v3188_v35 }
  0xed   : > { %2394 = vmatprep.subr.mxu0 %v2151_v12  ;;  %1410 = vmatprep.mubr.f32.mxu1 %v3208_v41 }
  0xee   : > { %2395 = vmatpush3.msra.mxu0 %v2135_v14  ;;  %2547 = vmatpush3.msra.mxu1 %v2161_v9 }
  0xef   : > { %2396 = vmatprep.subr.mxu0 %v2150_v15  ;;  %2538 = vmatmul.mubr.msk.f32.gmra.mxu0 %vm617_vm0, %v3193_v36 }
  0xf0   : > { %2397 = vmatpush3.msra.mxu0 %v2134_v16  ;;  %1411 = vmatmul.mubr.f32.gmra.mxu1 %v3219_v44 }
  0xf1   : > { %2398 = vmatprep.subr.mxu0 %v2149_v17  ;;  %1415 = vmatprep.mubr.f32.mxu1 %v3239_v50 }
  0xf2   : > { %2399 = vmatpush3.msra.mxu0 %v2133_v19  ;;  %2540 = vmatprep.mubr.msk.f32.mxu0 %vm617_vm0, %v3213_v42 }
  0xf3   : > { %2400 = vmatprep.subr.mxu0 %v2148_v21  ;;  %2541 = vmatmul.mubr.msk.f32.gmra.mxu0 %vm617_vm0, %v3224_v45 }
  0xf4   : > { %2401 = vmatpush3.msra.mxu0 %v2132_v22  ;;  %1416 = vmatmul.mubr.f32.gmra.mxu1 %v3250_v53 }
  0xf5   : > { %2402 = vmatprep.subr.mxu0 %v2147_v23  ;;  %1420 = vmatprep.mubr.f32.mxu1 %v3270_v61 }
  0xf6   : > { %2403 = vmatpush3.msra.mxu0 %v2131_v24  ;;  %2548 = vmatprep.subr.mxu1 %v2160_v26 }
  0xf7   : > { %2404 = vmatprep.subr.mxu0 %v2146_v28  ;;  %2549 = vmatpush3.msra.mxu1 %v2160_v26  ;;  %v3508_v28 = vld [vmem:[%s3647_s3 + $0x8] sm:$0xff] }
  0xf8   : > { %2405 = vmatpush3.msra.mxu0 %v2130_v29  ;;  %1421 = vmatmul.mubr.f32.gmra.mxu1 %v3276_v63 }
  0xf9   : > { %2406 = vmatprep.subr.mxu0 %v2145_v30  ;;  %1425 = vmatprep.mubr.f32.mxu1 %v3289_v4 }
  0xfa   : > { %2407 = vmatpush3.msra.mxu0 %v2129_v31  ;;  %2550 = vmatprep.subr.mxu1 %v2159_v34 }
  0xfb   : > { %2408 = vmatprep.subr.mxu0 %v2144_v37  ;;  %2551 = vmatpush3.msra.mxu1 %v2159_v34  ;;  %v3513_v37 = vld [vmem:[%s3647_s3] sm:$0xff] }
  0xfc   : > { %2409 = vmatpush3.msra.mxu0 %v2128_v38  ;;  %1426 = vmatmul.mubr.f32.gmra.mxu1 %v3295_v6  ;;  %v3518_v38 = vld [vmem:[%s3647_s3 + $0x10] sm:$0xff] }
  0xfd   : > { %2410 = vmatprep.subr.mxu0 %v2143_v39  ;;  %1430 = vmatprep.mubr.f32.mxu1 %v3308_v11 }
  0xfe   : > { %2411 = vmatpush3.msra.mxu0 %v2127_v40  ;;  %2543 = vmatprep.mubr.msk.f32.mxu0 %vm617_vm0, %v3244_v51 }
  0xff   : > { %2412 = vmatprep.subr.mxu0 %v2142_v43  ;;  %2552 = vmatprep.subr.mxu1 %v2158_v46 }
 0x100   : > { %2413 = vmatpush3.msra.mxu0 %v2126_v47  ;;  %1431 = vmatmul.mubr.f32.gmra.mxu1 %v3314_v13 }
 0x101   : > { %2414 = vmatprep.subr.mxu0 %v2141_v48  ;;  %2544 = vmatmul.mubr.msk.f32.gmra.mxu0 %vm617_vm0, %v3255_v54  ;;  %v3525_v48 = vld [vmem:[%s3647_s3 + $0x18] sm:$0xff] }
 0x102   : > { %2415 = vmatpush3.msra.mxu0 %v2125_v49  ;;  %2553 = vmatpush3.msra.mxu1 %v2158_v46 }
 0x103   : > { %2416 = vmatprep.subr.mxu0 %v2140_v52  ;;  %1435 = vmatprep.mubr.f32.mxu1 %v3327_v18 }
 0x104   : > { %2417 = vmatpush3.msra.mxu0 %v2124_v55  ;;  %2554 = vmatprep.subr.mxu1 %v2157_v56 }
 0x105   : > { %2418 = vmatprep.subr.mxu0 %v2139_v58  ;;  %1436 = vmatmul.mubr.f32.gmra.mxu1 %v3333_v20 }
 0x106   : > { %2419 = vmatpush3.msra.mxu0 %v2123_v59  ;;  %2555 = vmatpush3.msra.mxu1 %v2157_v56 }
 0x107   : > { %2420 = vmatprep.subr.mxu0 %v2138_v62  ;;  %2556 = vmatprep.subr.mxu1 %v2156_v0 }
 0x108   : > { %2421 = vmatpush3.msra.mxu0 %v2122_v1  ;;  %1745 = vmatprep.mubr.f32.mxu0 %v3160_v25 }
 0x109   : > { %2557 = vmatpush3.msra.mxu1 %v2156_v0  ;;  %1746 = vmatmul.mubr.f32.vlgmr.msra.gmra.mxu0 %v3166_v27  ;;  %v3532_v0 = vld [vmem:[%s3647_s3 + $0x20] sm:$0xff] }
 0x10a   : > { %2558 = vmatprep.subr.mxu1 %v2155_v2  ;;  %1750 = vmatprep.mubr.f32.mxu0 %v3177_v32 }
 0x10b   : > { %2559 = vmatpush3.msra.mxu1 %v2155_v2  ;;  %2562 = vmatprep.mubr.msk.f32.mxu1 %vm617_vm0, %v3116_v57 }
 0x10c   : > { %2560 = vmatprep.subr.mxu1 %v2154_v3 }
 0x10d   : > { %2561 = vmatpush3.msra.mxu1 %v2154_v3  ;;  %1751 = vmatmul.mubr.f32.gmra.mxu0 %v3188_v35 }
 0x10e   : > { %2563 = vmatmul.mubr.msk.f32.vlgmr.msra.gmra.mxu1 %vm617_vm0, %v3123_v60  ;;  %1755 = vmatprep.mubr.f32.mxu0 %v3208_v41 }
 0x10f   : > { %2565 = vmatprep.mubr.msk.f32.mxu1 %vm617_vm0, %v3182_v33 }
 0x111   : > { %1756 = vmatmul.mubr.f32.gmra.mxu0 %v3219_v44 }
 0x112   : > { %1760 = vmatprep.mubr.f32.mxu0 %v3239_v50  ;;  %2566 = vmatmul.mubr.msk.f32.gmra.mxu1 %vm617_vm0, %v3193_v36 }
 0x113   : > { %2568 = vmatprep.mubr.msk.f32.mxu1 %vm617_vm0, %v3213_v42 }
 0x115   : > { %1761 = vmatmul.mubr.f32.gmra.mxu0 %v3250_v53 }
 0x116   : > { %1765 = vmatprep.mubr.f32.mxu0 %v3270_v61  ;;  %2569 = vmatmul.mubr.msk.f32.gmra.mxu1 %vm617_vm0, %v3224_v45 }
 0x117   : > { %2571 = vmatprep.mubr.msk.f32.mxu1 %vm617_vm0, %v3244_v51 }
 0x119   : > { %1766 = vmatmul.mubr.f32.gmra.mxu0 %v3276_v63 }
 0x11a   : > { %1770 = vmatprep.mubr.f32.mxu0 %v3289_v4  ;;  %2572 = vmatmul.mubr.msk.f32.gmra.mxu1 %vm617_vm0, %v3255_v54 }
 0x11d   : > { %1771 = vmatmul.mubr.f32.gmra.mxu0 %v3295_v6  ;;  %v3498_v6 = vstv %s550_s14 }
 0x11e   : > { %1775 = vmatprep.mubr.f32.mxu0 %v3308_v11 }
 0x121   : > { %1776 = vmatmul.mubr.f32.gmra.mxu0 %v3314_v13 }
 0x122   : > { %1780 = vmatprep.mubr.f32.mxu0 %v3327_v18 }
 0x125   : > { %1781 = vmatmul.mubr.f32.gmra.mxu0 %v3333_v20 }
 0x159   : > { %v2480_v57 = vpop.f32.mrf.mxu1 }
 0x15b   : > { %v813_v25 = vpop.f32.mrf.mxu1 }
 0x168   : > { %v2206_v60 = vpop.f32.mrf.mxu0 }
 0x16a   : > { %v2207_v27 = vpop.f32.mrf.mxu0 }
 0x16b   : > { %v2208_v54 = vadd.f32 %v2207_v27, %v2206_v60 }
 0x16d   : > { %v2209_v32 = vpop.f32.mrf.mxu0  ;;  %v2483_v33 = vpop.f32.mrf.mxu1  ;;  %v709_v5 = vadd.f32 %v2208_v54, %v3498_v6 }
 0x16f   : > { %v2210_v35 = vpop.f32.mrf.mxu0  ;;  %v823_v36 = vpop.f32.mrf.mxu1  ;;  %v814_v15 = vadd.f32 %v813_v25, %v709_v5 }
 0x170   : > { %v2211_v50 = vadd.f32 %v2210_v35, %v2209_v32  ;;  %v3539_v32 = vld [vmem:[%s3647_s3 + $0x28] sm:$0xff] }
 0x171   : > { %v852_v30 = vmax.f32 %v814_v15, 0.0 }
 0x172   : > { %v2212_v41 = vpop.f32.mrf.mxu0  ;;  %v2486_v42 = vpop.f32.mrf.mxu1  ;;  %v714_v11 = vadd.f32 %v2211_v50, %v3498_v6 }
 0x173   : > { %v868_v56 = vmul.f32 %v3513_v37, %v852_v30 }
 0x174   : > { %v2213_v44 = vpop.f32.mrf.mxu0  ;;  %v833_v45 = vpop.f32.mrf.mxu1  ;;  %v819_v10 = vadd.f32 %v2480_v57, %v714_v11 }
 0x175   : > { %v2214_v61 = vadd.f32 %v2213_v44, %v2212_v41 }
 0x176   : > { %v853_v22 = vmax.f32 %v819_v10, 0.0 }
 0x177   : > { %v2215_v51 = vpop.f32.mrf.mxu0  ;;  %v3496_v53 = vpop.f32.mrf.mxu1  ;;  %v719_v7 = vadd.f32 %v2214_v61, %v3498_v6  ;;  %v3546_v61 = vld [vmem:[%s3647_s3 + $0x30] sm:$0xff] }
 0x178   : > { %v869_v46 = vmul.f32 %v3508_v28, %v853_v22 }
 0x179   : > { %v2216_v63 = vpop.f32.mrf.mxu0  ;;  %v843_v4 = vpop.f32.mrf.mxu1  ;;  %v824_v16 = vadd.f32 %v823_v36, %v719_v7 }
 0x17a   : > { %v2217_v13 = vadd.f32 %v2216_v63, %v2215_v51  ;;  %v876_v1 = vadd.f32 %v869_v46, %v868_v56 }
 0x17b   : > { %v854_v31 = vmax.f32 %v824_v16, 0.0 }
 0x17c   : > { %v2218_v18 = vpop.f32.mrf.mxu0  ;;  %v2278_v20 = vpop.f32.mrf.mxu1  ;;  %v724_v12 = vadd.f32 %v2217_v13, %v3498_v6 }
 0x17d   : > { %v870_v58 = vmul.f32 %v3518_v38, %v854_v31 }
 0x17e   : > { %v2219_v8 = vpop.f32.mrf.mxu0  ;;  %v2279_v9 = vpop.f32.mrf.mxu1  ;;  %v829_v23 = vadd.f32 %v2483_v33, %v724_v12 }
 0x17f   : > { %v2220_v14 = vadd.f32 %v2219_v8, %v2218_v18  ;;  %v2280_v27 = vadd.f32 %v2279_v9, %v2278_v20  ;;  %v877_v35 = vadd.f32 %v876_v1, %v870_v58 }
 0x180   : > { %v855_v47 = vmax.f32 %v829_v23, 0.0 }
 0x181   : > { %v729_v17 = vadd.f32 %v2220_v14, %v3498_v6  ;;  %v2221_v19 = vpop.f32.mrf.mxu0  ;;  %v2281_v21 = vpop.f32.mrf.mxu1  ;;  %v3556_v14 = vld [vmem:[%s3647_s3 + $0x38] sm:$0xff] }
 0x182   : > { %v871_v2 = vmul.f32 %v3525_v48, %v855_v47 }
 0x183   : > { %v2222_v24 = vpop.f32.mrf.mxu0  ;;  %v2282_v26 = vpop.f32.mrf.mxu1  ;;  %v834_v34 = vadd.f32 %v833_v45, %v729_v17 }
 0x184   : > { %v2223_v29 = vadd.f32 %v2222_v24, %v2221_v19  ;;  %v2283_v33 = vadd.f32 %v2282_v26, %v2281_v21  ;;  %v878_v50 = vadd.f32 %v877_v35, %v871_v2 }
 0x185   : > { %v856_v59 = vmax.f32 %v834_v34, 0.0 }
 0x186   : > { %v734_v39 = vadd.f32 %v2223_v29, %v3498_v6  ;;  %v2224_v40 = vpop.f32.mrf.mxu0  ;;  %v2284_v43 = vpop.f32.mrf.mxu1  ;;  %v1063_v18 = vadd.f32 %v2283_v33, %v3498_v6 }
 0x187   : > { %v872_v36 = vmul.f32 %v3532_v0, %v856_v59 }
 0x188   : > { %v839_v49 = vadd.f32 %v2486_v42, %v734_v39  ;;  %v2225_v52 = vpop.f32.mrf.mxu0  ;;  %v2285_v55 = vpop.f32.mrf.mxu1 }
 0x189   : > { %v2226_v62 = vadd.f32 %v2225_v52, %v2224_v40  ;;  %v879_v20 = vadd.f32 %v878_v50, %v872_v36  ;;  %v2286_v8 = vadd.f32 %v2285_v55, %v2284_v43 }
 0x18a   : > { %v857_v3 = vmax.f32 %v839_v49, 0.0 }
 0x18b   : > { %v739_v57 = vadd.f32 %v2226_v62, %v3498_v6  ;;  %v2227_v60 = vpop.f32.mrf.mxu0  ;;  %v2287_v25 = vpop.f32.mrf.mxu1 }
 0x18c   : > { %v873_v51 = vmul.f32 %v3539_v32, %v857_v3 }
 0x18d   : > { %v844_v41 = vadd.f32 %v843_v4, %v739_v57  ;;  %v2228_v42 = vpop.f32.mrf.mxu0  ;;  %v2288_v44 = vpop.f32.mrf.mxu1  ;;  %v1058_v4 = vadd.f32 %v2280_v27, %v3498_v6 }
 0x18e   : > { %v2229_v45 = vadd.f32 %v2228_v42, %v2227_v60  ;;  %v2289_v11 = vadd.f32 %v2288_v44, %v2287_v25  ;;  %v880_v12 = vadd.f32 %v879_v20, %v873_v51 }
 0x18f   : > { %v858_v54 = vmax.f32 %v844_v41, 0.0 }
 0x190   : > { %v744_v63 = vadd.f32 %v2229_v45, %v3498_v6  ;;  %v2290_v13 = vpop.f32.mrf.mxu1  ;;  %v1073_v21 = vadd.f32 %v2289_v11, %v3498_v6 }
 0x191   : > { %v2508_v5 = vpop.f32.mrf.mxu0  ;;  %v874_v7 = vmul.f32 %v3546_v61, %v858_v54 }
 0x192   : > { %v849_v9 = vadd.f32 %v3496_v53, %v744_v63  ;;  %v2291_v10 = vpop.f32.mrf.mxu1  ;;  %v1168_v17 = vadd.f32 %v2508_v5, %v1063_v18  ;;  %v1068_v53 = vadd.f32 %v2286_v8, %v3498_v6 }
 0x193   : > { %v1162_v15 = vpop.f32.mrf.mxu0  ;;  %v881_v22 = vadd.f32 %v880_v12, %v874_v7  ;;  %v2292_v29 = vadd.f32 %v2291_v10, %v2290_v13  ;;  %v3568_v13 = vstv %s2015_s24 }
 0x194   : > { %v859_v16 = vmax.f32 %v849_v9, 0.0  ;;  %v1163_v19 = vadd.f32 %v1162_v15, %v1058_v4  ;;  %v1202_v34 = vmax.f32 %v1168_v17, 0.0 }
 0x195   : > { %v1078_v56 = vadd.f32 %v2292_v29, %v3498_v6 }
 0x196   : > { %v875_v23 = vmul.f32 %v3556_v14, %v859_v16  ;;  %v1201_v24 = vmax.f32 %v1163_v19, 0.0  ;;  %v2293_v26 = vpop.f32.mrf.mxu1  ;;  %v1218_v59 = vmul.f32 %v1202_v34, %v3508_v28 }
 0x197   : > { %v2511_v30 = vpop.f32.mrf.mxu0 }
 0x198   : > { %v882_v31 = vadd.f32 %v881_v22, %v875_v23  ;;  %v1178_v39 = vadd.f32 %v2511_v30, %v1073_v21  ;;  %v2294_v40 = vpop.f32.mrf.mxu1  ;;  %v1217_v49 = vmul.f32 %v1201_v24, %v3513_v37 }
 0x199   : > { %v2295_v43 = vadd.f32 %v2294_v40, %v2293_v26  ;;  %v1172_v46 = vpop.f32.mrf.mxu0 }
 0x19a   : > { %v883_v47 = vrot.slane %v882_v31, 4  ;;  %v1173_v52 = vadd.f32 %v1172_v46, %v1068_v53  ;;  %v1204_v62 = vmax.f32 %v1178_v39, 0.0  ;;  %v1225_v60 = vadd.f32 %v1218_v59, %v1217_v49 }
 0x19b   : > { %v1083_v55 = vadd.f32 %v2295_v43, %v3498_v6 }
 0x19c   : > { %v884_v58 = vadd.f32 %v883_v47, %v882_v31  ;;  %v1203_v1 = vmax.f32 %v1173_v52, 0.0  ;;  %v2296_v2 = vpop.f32.mrf.mxu1  ;;  %v1220_v42 = vmul.f32 %v1204_v62, %v3525_v48 }
 0x19d   : > { %v2514_v3 = vpop.f32.mrf.mxu0 }
 0x19e   : > { %v885_v57 = vrot.slane %v884_v58, 2  ;;  %v1219_v25 = vmul.f32 %v1203_v1, %v3518_v38  ;;  %v2297_v27 = vpop.f32.mrf.mxu1  ;;  %v1188_v33 = vadd.f32 %v2514_v3, %v1083_v55 }
 0x19f   : > { %v2298_v35 = vadd.f32 %v2297_v27, %v2296_v2  ;;  %v1182_v36 = vpop.f32.mrf.mxu0 }
 0x1a0   : > { %v886_v41 = vadd.f32 %v885_v57, %v884_v58  ;;  %v1226_v44 = vadd.f32 %v1225_v60, %v1219_v25  ;;  %v1183_v45 = vadd.f32 %v1182_v36, %v1078_v56  ;;  %v1206_v18 = vmax.f32 %v1188_v33, 0.0 }
 0x1a1   : > { %v1088_v11 = vadd.f32 %v2298_v35, %v3498_v6 }
 0x1a2   : > { %v887_v50 = vrot.slane %v886_v41, 1  ;;  %v1205_v51 = vmax.f32 %v1183_v45, 0.0  ;;  %v1227_v54 = vadd.f32 %v1226_v44, %v1220_v42  ;;  %v2299_v63 = vpop.f32.mrf.mxu1  ;;  %v1222_v16 = vmul.f32 %v1206_v18, %v3539_v32 }
 0x1a3   : > { %v2517_v4 = vpop.f32.mrf.mxu0 }
 0x1a4   : > { %v888_v20 = vadd.f32 %v887_v50, %v886_v41  ;;  %v1221_v5 = vmul.f32 %v1205_v51, %v3532_v0  ;;  %v2300_v7 = vpop.f32.mrf.mxu1 }
 0x1a5   : > { %v2301_v8 = vadd.f32 %v2300_v7, %v2299_v63  ;;  %v1192_v9 = vpop.f32.mrf.mxu0 }
 0x1a6   : > { %v890_v10 = vadd.f32 %v3568_v13, %v888_v20  ;;  %v1228_v12 = vadd.f32 %v1227_v54, %v1221_v5  ;;  %v1193_v15 = vadd.f32 %v1192_v9, %v1088_v11 }
 0x1a7   : > { %v1093_v17 = vadd.f32 %v2301_v8, %v3498_v6 }
 0x1a8   : > { %v891_v19 = vsub.f32 0.0, %v890_v10  ;;  %v1207_v21 = vmax.f32 %v1193_v15, 0.0  ;;  %v2350_v22 = vpop.f32.mrf.mxu1  ;;  %v1229_v24 = vadd.f32 %v1228_v12, %v1222_v16 }
 0x1a9   : > { %v1198_v23 = vadd.f32 %v2517_v4, %v1093_v17  ;;  %v2536_v40 = vpop.f32.mrf.mxu0 }
 0x1aa   : > { %v892_v26 = vmul.f32 1.442695, %v891_v19  ;;  %v1223_v53 = vmul.f32 %v1207_v21, %v3546_v61  ;;  %v2351_v29 = vpop.f32.mrf.mxu1 }
 0x1ab   : > { %v1208_v30 = vmax.f32 %v1198_v23, 0.0  ;;  %v1507_v52 = vpop.f32.mrf.mxu0  ;;  %v2352_v62 = vadd.f32 %v2351_v29, %v2350_v22 }
 0x1ac   : > { %2611 = vpow2.f32 %v892_v26  ;;  %v2353_v31 = vpop.f32.mrf.mxu1  ;;  %v1230_v39 = vadd.f32 %v1229_v24, %v1223_v53 }
 0x1ad   : > { %v1224_v34 = vmul.f32 %v1208_v30, %v3556_v14  ;;  %v1403_v35 = vadd.f32 %v2352_v62, %v3498_v6 }
 0x1ae   : > { %v2354_v43 = vpop.f32.mrf.mxu1 }
 0x1af   : > { %v1231_v46 = vadd.f32 %v1230_v39, %v1224_v34  ;;  %v2355_v55 = vadd.f32 %v2354_v43, %v2353_v31  ;;  %v2539_v59 = vpop.f32.mrf.mxu0  ;;  %v1508_v4 = vadd.f32 %v1507_v52, %v1403_v35  ;;  %v897_v34 = vlaneseq }
 0x1b0   : > { %v2356_v47 = vpop.f32.mrf.mxu1 }
 0x1b1   : > { %v1232_v49 = vrot.slane %v1231_v46, 4  ;;  %v1408_v57 = vadd.f32 %v2355_v55, %v3498_v6  ;;  %v1517_v33 = vpop.f32.mrf.mxu0  ;;  %v1546_v19 = vmax.f32 %v1508_v4, 0.0  ;;  %vm3595_vm1 = vcmp.lt.s32.totalorder %v897_v34, 128 }
 0x1b2   : > { %v2357_v56 = vpop.f32.mrf.mxu1 }
 0x1b3   : > { %v1233_v58 = vadd.f32 %v1232_v49, %v1231_v46  ;;  %v2358_v1 = vadd.f32 %v2357_v56, %v2356_v47  ;;  %v2542_v45 = vpop.f32.mrf.mxu0  ;;  %v1513_v51 = vadd.f32 %v2536_v40, %v1408_v57  ;;  %v1562_v43 = vmul.f32 %v1546_v19, %v3513_v37 }
 0x1b4   : > { %v2359_v2 = vpop.f32.mrf.mxu1 }
 0x1b5   : > { %v1234_v3 = vrot.slane %v1233_v58, 2  ;;  %v1413_v36 = vadd.f32 %v2358_v1, %v3498_v6  ;;  %v1527_v9 = vpop.f32.mrf.mxu0  ;;  %v1547_v10 = vmax.f32 %v1513_v51, 0.0 }
 0x1b6   : > { %v2360_v60 = vpop.f32.mrf.mxu1 }
 0x1b7   : > { %v1235_v25 = vadd.f32 %v1234_v3, %v1233_v58  ;;  %v2361_v27 = vadd.f32 %v2360_v60, %v2359_v2  ;;  %v1518_v20 = vadd.f32 %v1517_v33, %v1413_v36  ;;  %v1563_v53 = vmul.f32 %v1547_v10, %v3508_v28 }
 0x1b8   : > { %v2362_v41 = vpop.f32.mrf.mxu1 }
 0x1b9   : > { %v2612_v42 = vpop.eup %2611  ;;  %v1236_v44 = vrot.slane %v1235_v25, 1  ;;  %v1418_v54 = vadd.f32 %v2361_v27, %v3498_v6  ;;  %v1548_v21 = vmax.f32 %v1518_v20, 0.0  ;;  %v1570_v56 = vadd.f32 %v1563_v53, %v1562_v43 }
 0x1ba   : > { %v894_v50 = vadd.f32 1.0, %v2612_v42  ;;  %v2363_v63 = vpop.f32.mrf.mxu1 }
 0x1bb   : > { %v1237_v11 = vadd.f32 %v1236_v44, %v1235_v25  ;;  %v2364_v18 = vadd.f32 %v2363_v63, %v2362_v41  ;;  %v1523_v12 = vadd.f32 %v2539_v59, %v1418_v54  ;;  %v1564_v46 = vmul.f32 %v1548_v21, %v3518_v38 }
 0x1bc   : > { %2613 = vrcp.f32 %v894_v50  ;;  %v2365_v5 = vpop.f32.mrf.mxu1 }
 0x1bd   : > { %v1238_v7 = vadd.f32 %v1237_v11, %v3568_v13  ;;  %v1423_v8 = vadd.f32 %v2364_v18, %v3498_v6  ;;  %v1549_v29 = vmax.f32 %v1523_v12, 0.0  ;;  %v1571_v3 = vadd.f32 %v1570_v56, %v1564_v46 }
 0x1be   : > { %v2366_v15 = vpop.f32.mrf.mxu1 }
 0x1bf   : > { %v1239_v16 = vsub.f32 0.0, %v1238_v7  ;;  %v2367_v17 = vadd.f32 %v2366_v15, %v2365_v5  ;;  %v1528_v22 = vadd.f32 %v1527_v9, %v1423_v8  ;;  %v1565_v55 = vmul.f32 %v1549_v29, %v3525_v48 }
 0x1c0   : > { %v2368_v23 = vpop.f32.mrf.mxu1 }
 0x1c1   : > { %v1240_v24 = vmul.f32 1.442695, %v1239_v16  ;;  %v1428_v26 = vadd.f32 %v2367_v17, %v3498_v6  ;;  %v2545_v31 = vpop.f32.mrf.mxu0  ;;  %v1550_v47 = vmax.f32 %v1528_v22, 0.0  ;;  %v1572_v36 = vadd.f32 %v1571_v3, %v1565_v55 }
 0x1c2   : > { %v2369_v30 = vpop.f32.mrf.mxu1 }
 0x1c3   : > { %2615 = vpow2.f32 %v1240_v24  ;;  %v1533_v39 = vadd.f32 %v2542_v45, %v1428_v26  ;;  %v2370_v40 = vadd.f32 %v2369_v30, %v2368_v23  ;;  %v1537_v59 = vpop.f32.mrf.mxu0  ;;  %v1566_v57 = vmul.f32 %v1550_v47, %v3532_v0 }
 0x1c5   : > { %v2371_v49 = vpop.f32.mrf.mxu1  ;;  %v1433_v52 = vadd.f32 %v2370_v40, %v3498_v6  ;;  %v1551_v58 = vmax.f32 %v1533_v39, 0.0  ;;  %v1573_v44 = vadd.f32 %v1572_v36, %v1566_v57 }
 0x1c7   : > { %v1538_v1 = vadd.f32 %v1537_v59, %v1433_v52  ;;  %v2372_v2 = vpop.f32.mrf.mxu1  ;;  %v1567_v35 = vmul.f32 %v1551_v58, %v3539_v32 }
 0x1c8   : > { %v2373_v60 = vadd.f32 %v2372_v2, %v2371_v49 }
 0x1c9   : > { %v2614_v25 = vpop.eup %2613  ;;  %v1552_v27 = vmax.f32 %v1538_v1, 0.0  ;;  %v2422_v33 = vpop.f32.mrf.mxu0  ;;  %v1574_v54 = vadd.f32 %v1573_v44, %v1567_v35 }
 0x1ca   : > { %901 = vst.msk [vmem:[%s3593_s26] sm:$0x1] %vm3595_vm1, %v2614_v25  ;;  %v1438_v41 = vadd.f32 %v2373_v60, %v3498_v6 }
 0x1cb   : > { %v2423_v42 = vpop.f32.mrf.mxu0  ;;  %v1568_v45 = vmul.f32 %v1552_v27, %v3546_v61 }
 0x1cc   : > { %v1543_v50 = vadd.f32 %v2545_v31, %v1438_v41  ;;  %v2424_v15 = vadd.f32 %v2423_v42, %v2422_v33 }
 0x1cd   : > { %v2425_v51 = vpop.f32.mrf.mxu0  ;;  %v1575_v20 = vadd.f32 %v1574_v54, %v1568_v45 }
 0x1ce   : > { %v1553_v63 = vmax.f32 %v1543_v50, 0.0  ;;  %v2564_v11 = vpop.f32.mrf.mxu1  ;;  %v1748_v26 = vadd.f32 %v2424_v15, %v3498_v6 }
 0x1cf   : > { %v2426_v18 = vpop.f32.mrf.mxu0 }
 0x1d0   : > { %v2616_v4 = vpop.eup %2615  ;;  %v1569_v5 = vmul.f32 %v1553_v63, %v3556_v14  ;;  %v2427_v8 = vadd.f32 %v2426_v18, %v2425_v51  ;;  %v1852_v9 = vpop.f32.mrf.mxu1 }
 0x1d1   : > { %v1242_v7 = vadd.f32 1.0, %v2616_v4  ;;  %v2428_v10 = vpop.f32.mrf.mxu0  ;;  %v1853_v49 = vadd.f32 %v1852_v9, %v1748_v26 }
 0x1d2   : > { %v1576_v12 = vadd.f32 %v1575_v20, %v1569_v5  ;;  %v2567_v17 = vpop.f32.mrf.mxu1  ;;  %v1753_v22 = vadd.f32 %v2427_v8, %v3498_v6 }
 0x1d3   : > { %2617 = vrcp.f32 %v1242_v7  ;;  %v2429_v16 = vpop.f32.mrf.mxu0  ;;  %v1891_v25 = vmax.f32 %v1853_v49, 0.0 }
 0x1d4   : > { %v1577_v19 = vrot.slane %v1576_v12, 4  ;;  %v2430_v21 = vadd.f32 %v2429_v16, %v2428_v10  ;;  %v1862_v30 = vpop.f32.mrf.mxu1  ;;  %v1858_v39 = vadd.f32 %v2564_v11, %v1753_v22 }
 0x1d5   : > { %v2431_v23 = vpop.f32.mrf.mxu0  ;;  %v1907_v11 = vmul.f32 %v1891_v25, %v3513_v37 }
 0x1d6   : > { %v1578_v24 = vadd.f32 %v1577_v19, %v1576_v12  ;;  %v1758_v29 = vadd.f32 %v2430_v21, %v3498_v6  ;;  %v2570_v43 = vpop.f32.mrf.mxu1  ;;  %v1892_v59 = vmax.f32 %v1858_v39, 0.0 }
 0x1d7   : > { %v2432_v53 = vpop.f32.mrf.mxu0 }
 0x1d8   : > { %v1579_v31 = vrot.slane %v1578_v24, 2  ;;  %v2433_v34 = vadd.f32 %v2432_v53, %v2431_v23  ;;  %v1863_v52 = vadd.f32 %v1862_v30, %v1758_v29  ;;  %v1872_v2 = vpop.f32.mrf.mxu1  ;;  %v1908_v44 = vmul.f32 %v1892_v59, %v3508_v28 }
 0x1d9   : > { %v2434_v40 = vpop.f32.mrf.mxu0 }
 0x1da   : > { %v1580_v46 = vadd.f32 %v1579_v31, %v1578_v24  ;;  %v1763_v47 = vadd.f32 %v2433_v34, %v3498_v6  ;;  %v1893_v27 = vmax.f32 %v1863_v52, 0.0  ;;  %v2573_v50 = vpop.f32.mrf.mxu1  ;;  %v1915_v9 = vadd.f32 %v1908_v44, %v1907_v11 }
 0x1db   : > { %v2435_v55 = vpop.f32.mrf.mxu0 }
 0x1dc   : > { %v1581_v56 = vrot.slane %v1580_v46, 1  ;;  %v2436_v58 = vadd.f32 %v2435_v55, %v2434_v40  ;;  %v1868_v57 = vadd.f32 %v2567_v17, %v1763_v47  ;;  %v1909_v18 = vmul.f32 %v1893_v27, %v3518_v38  ;;  %v1882_v12 = vpop.f32.mrf.mxu1 }
 0x1dd   : > { %v2437_v1 = vpop.f32.mrf.mxu0 }
 0x1de   : > { %v1582_v3 = vadd.f32 %v1581_v56, %v1580_v46  ;;  %v1768_v60 = vadd.f32 %v2436_v58, %v3498_v6  ;;  %v1894_v54 = vmax.f32 %v1868_v57, 0.0  ;;  %v1916_v19 = vadd.f32 %v1915_v9, %v1909_v18 }
 0x1df   : > { %v2438_v33 = vpop.f32.mrf.mxu0 }
 0x1e0   : > { %v2618_v35 = vpop.eup %2617  ;;  %v1583_v36 = vadd.f32 %v1582_v3, %v3568_v13  ;;  %v2439_v41 = vadd.f32 %v2438_v33, %v2437_v1  ;;  %v1873_v42 = vadd.f32 %v1872_v2, %v1768_v60  ;;  %v1910_v28 = vmul.f32 %v1894_v54, %v3525_v48 }
 0x1e1   : > { %2072 = vst.msk [vmem:[%s3593_s26 + $0x1] sm:$0x1] %vm3595_vm1, %v2618_v35  ;;  %v2440_v45 = vpop.f32.mrf.mxu0 }
 0x1e2   : > { %v1584_v51 = vsub.f32 0.0, %v1583_v36  ;;  %v1773_v63 = vadd.f32 %v2439_v41, %v3498_v6  ;;  %v1895_v7 = vmax.f32 %v1873_v42, 0.0  ;;  %v1917_v23 = vadd.f32 %v1916_v19, %v1910_v28 }
 0x1e3   : > { %v2441_v4 = vpop.f32.mrf.mxu0 }
 0x1e4   : > { %v1585_v20 = vmul.f32 1.442695, %v1584_v51  ;;  %v1878_v5 = vadd.f32 %v2570_v43, %v1773_v63  ;;  %v2442_v8 = vadd.f32 %v2441_v4, %v2440_v45  ;;  %v1911_v37 = vmul.f32 %v1895_v7, %v3532_v0 }
 0x1e5   : > { %v2443_v10 = vpop.f32.mrf.mxu0 }
 0x1e6   : > { %2619 = vpow2.f32 %v1585_v20  ;;  %v1896_v15 = vmax.f32 %v1878_v5, 0.0  ;;  %v1778_v16 = vadd.f32 %v2442_v8, %v3498_v6  ;;  %v1918_v53 = vadd.f32 %v1917_v23, %v1911_v37 }
 0x1e7   : > { %v2444_v17 = vpop.f32.mrf.mxu0 }
 0x1e8   : > { %v2445_v21 = vadd.f32 %v2444_v17, %v2443_v10  ;;  %v1883_v38 = vadd.f32 %v1882_v12, %v1778_v16  ;;  %v1912_v22 = vmul.f32 %v1896_v15, %v3539_v32 }
 0x1ea   : > { %v1783_v24 = vadd.f32 %v2445_v21, %v3498_v6  ;;  %v1897_v26 = vmax.f32 %v1883_v38, 0.0  ;;  %v1919_v31 = vadd.f32 %v1918_v53, %v1912_v22 }
 0x1ec   : > { %v1888_v29 = vadd.f32 %v2573_v50, %v1783_v24  ;;  %v1913_v30 = vmul.f32 %v1897_v26, %v3546_v61 }
 0x1ee   : > { %v1898_v48 = vmax.f32 %v1888_v29, 0.0  ;;  %v1920_v39 = vadd.f32 %v1919_v31, %v1913_v30 }
 0x1f0   : > { %v1914_v34 = vmul.f32 %v1898_v48, %v3556_v14 }
 0x1f2   : > { %v1921_v40 = vadd.f32 %v1920_v39, %v1914_v34 }
 0x1f3   : > { %v2620_v0 = vpop.eup %2619 }
 0x1f4   : > { %v1587_v43 = vadd.f32 1.0, %v2620_v0  ;;  %v1922_v46 = vrot.slane %v1921_v40, 4 }
 0x1f6   : > { %2621 = vrcp.f32 %v1587_v43  ;;  %v1923_v32 = vadd.f32 %v1922_v46, %v1921_v40 }
 0x1f8   : > { %v1924_v47 = vrot.slane %v1923_v32, 2 }
 0x1fa   : > { %v1925_v6 = vadd.f32 %v1924_v47, %v1923_v32 }
 0x1fc   : > { %v1926_v49 = vrot.slane %v1925_v6, 1 }
 0x1fe   : > { %v1927_v52 = vadd.f32 %v1926_v49, %v1925_v6 }
 0x200   : > { %v1928_v55 = vadd.f32 %v1927_v52, %v3568_v13 }
 0x202   : > { %v1929_v61 = vsub.f32 0.0, %v1928_v55 }
 0x203   : > { %v2622_v56 = vpop.eup %2621 }
 0x204   : > { %2121 = vst.msk [vmem:[%s3593_s26 + $0x2] sm:$0x1] %vm3595_vm1, %v2622_v56  ;;  %v1930_v14 = vmul.f32 1.442695, %v1929_v61 }
 0x206   : > { %2623 = vpow2.f32 %v1930_v14 }
 0x213   : > { %v2624_v58 = vpop.eup %2623 }
 0x214   : > { %v1932_v59 = vadd.f32 1.0, %v2624_v58 }
 0x216   : > { %2625 = vrcp.f32 %v1932_v59 }
 0x223   : > { %v2626_v1 = vpop.eup %2625 }
 0x224   : > { %2170 = vst.msk [vmem:[%s3593_s26 + $0x3] sm:$0x1] %vm3595_vm1, %v2626_v1 }
 0x225 PF: > { %p12_p6 = scmp.ge.s32.totalorder %s2713_s19, 5   ;;  %s3654_s15 = smov %s2664_s16 }
 0x226   : > { %s3655_s16 = smov %s2723_s22  ;;  %s3656_s17 = smov %s2713_s19 }
 0x227   :  { %14 = sbr.rel (!%p12_p6) target bundleno = 2 (0x2), region = 105 }
 0x22c   :  { %1957 = vsyncpa [#allocation3], 1 }
 0x22d   :  { %1959 = vsyncpa [#allocation3 + $0x1], 1 }

</bundles_post_ra>
